<compile_context>
chip_gen: v7x
topology: tpu7x:2x2x1
jax: 0.10.0
libtpu: 0.0.40
codegen_flags: <defaults>
</compile_context>

<pallas_src>
import functools
import math

import jax
import jax.numpy as jnp
from jax.experimental import pallas as pl
from jax.experimental.pallas import tpu as pltpu


# ------------------------------------------------------------------
# Common helpers
# ------------------------------------------------------------------

_LN_EPS = 1e-6  # module uses partial(nn.LayerNorm, eps=1e-06)


def _compiler_params(n_axes):
    return pltpu.CompilerParams(
        dimension_semantics=("parallel",) * n_axes,
        vmem_limit_bytes=32 * 1024 * 1024,   # safe on v5e/v6e (128 MiB) and v7x (64 MiB)
    )


def _row_tile(m):
    # Whole-slab for small row counts (demo); 256-row tiles (multiple of the 8
    # sublanes, good MXU fill on 128/256-wide arrays) once pipelining pays off.
    return m if m <= 512 else 256


def _erf(x):
    # Abramowitz & Stegun 7.1.26, |error| <= 1.5e-7 (effectively exact in f32).
    a1, a2, a3, a4, a5 = 0.254829592, -0.284496736, 1.421413741, -1.453152027, 1.061405429
    p = 0.3275911
    z = jnp.abs(x)
    t = 1.0 / (1.0 + p * z)
    poly = t * (a1 + t * (a2 + t * (a3 + t * (a4 + t * a5))))
    y = 1.0 - poly * jnp.exp(-z * z)
    return jnp.where(x >= 0, y, -y)


def _gelu_exact(x):
    # nn.GELU() default = exact erf GELU.
    return 0.5 * x * (1.0 + _erf(x * (1.0 / math.sqrt(2.0))))


def _layernorm_f32(x, g, b, eps):
    mu = jnp.mean(x, axis=-1, keepdims=True)
    var = jnp.mean(jnp.square(x - mu), axis=-1, keepdims=True)
    return (x - mu) * jax.lax.rsqrt(var + eps) * g + b


# ------------------------------------------------------------------
# Pallas kernels (row-tiled; bf16 MXU inputs, f32 accumulation/statistics)
# ------------------------------------------------------------------

def _linear_kernel(x_ref, w_ref, b_ref, o_ref):
    acc = jnp.dot(x_ref[...].astype(jnp.bfloat16), w_ref[...],
                  preferred_element_type=jnp.float32)
    o_ref[...] = (acc + b_ref[...]).astype(o_ref.dtype)


def _ln_linear_kernel(x_ref, g_ref, bn_ref, w_ref, b_ref, o_ref, *, eps):
    x = x_ref[...].astype(jnp.float32)
    xn = _layernorm_f32(x, g_ref[...], bn_ref[...], eps)
    acc = jnp.dot(xn.astype(jnp.bfloat16), w_ref[...],
                  preferred_element_type=jnp.float32)
    o_ref[...] = (acc + b_ref[...]).astype(o_ref.dtype)


def _linear_residual_kernel(x_ref, w_ref, b_ref, r_ref, o_ref):
    acc = jnp.dot(x_ref[...].astype(jnp.bfloat16), w_ref[...],
                  preferred_element_type=jnp.float32)
    o_ref[...] = (r_ref[...].astype(jnp.float32) + acc + b_ref[...]).astype(o_ref.dtype)


def _ln_mlp_residual_kernel(x_ref, g_ref, bn_ref, w1_ref, b1_ref, w2_ref, b2_ref,
                            o_ref, *, eps):
    x = x_ref[...].astype(jnp.float32)
    xn = _layernorm_f32(x, g_ref[...], bn_ref[...], eps)
    h = jnp.dot(xn.astype(jnp.bfloat16), w1_ref[...],
                preferred_element_type=jnp.float32) + b1_ref[...]
    h = _gelu_exact(h)                                   # fused, stays in VMEM
    y = jnp.dot(h.astype(jnp.bfloat16), w2_ref[...],
                preferred_element_type=jnp.float32) + b2_ref[...]
    o_ref[...] = (x + y).astype(o_ref.dtype)             # fused residual add


def _attention_kernel(qkv_ref, o_ref, *, n_heads, scale):
    qkv = qkv_ref[0].astype(jnp.float32)                 # (T, 3E) slab for this batch
    e = qkv.shape[-1] // 3
    dh = e // n_heads
    outs = []
    for h in range(n_heads):                             # static, unrolled
        q = (qkv[:, h * dh:(h + 1) * dh] * scale).astype(jnp.bfloat16)   # scale folded into q
        k = qkv[:, e + h * dh: e + (h + 1) * dh].astype(jnp.bfloat16)
        v = qkv[:, 2 * e + h * dh: 2 * e + (h + 1) * dh].astype(jnp.bfloat16)
        s = jnp.dot(q, k.T, preferred_element_type=jnp.float32)          # (T, T)
        s = s - jnp.max(s, axis=-1, keepdims=True)
        p = jnp.exp(s)
        p = p * pl.reciprocal(jnp.sum(p, axis=-1, keepdims=True), approx=True)
        outs.append(jnp.dot(p.astype(jnp.bfloat16), v,
                            preferred_element_type=jnp.float32))
    o_ref[0] = jnp.concatenate(outs, axis=-1).astype(o_ref.dtype)


# ------------------------------------------------------------------
# pallas_call wrappers
# ------------------------------------------------------------------

def linear(x, w, b, *, ln=None):
    """x:(M,K) f32, w:(K,N) bf16, b:(N,) f32 -> (M,N) f32. Optional fused LayerNorm."""
    M, K = x.shape
    N = w.shape[1]
    tm = _row_tile(M)
    row_spec = pl.BlockSpec((tm, K), lambda i: (i, 0))
    out_spec = pl.BlockSpec((tm, N), lambda i: (i, 0))
    full = lambda shape: pl.BlockSpec(shape, lambda i: (0, 0))
    cost = pl.CostEstimate(flops=2 * M * K * N, transcendentals=0,
                           bytes_accessed=4 * M * K + 2 * K * N + 4 * M * N)
    if ln is None:
        kern = _linear_kernel
        args = (x, w, b.reshape(1, N))
        in_specs = [row_spec, full((K, N)), full((1, N))]
    else:
        g, bn = ln
        kern = functools.partial(_ln_linear_kernel, eps=_LN_EPS)
        args = (x, g.reshape(1, K), bn.reshape(1, K), w, b.reshape(1, N))
        in_specs = [row_spec, full((1, K)), full((1, K)), full((K, N)), full((1, N))]
    return pl.pallas_call(
        kern,
        out_shape=jax.ShapeDtypeStruct((M, N), jnp.float32),
        grid=(pl.cdiv(M, tm),),
        in_specs=in_specs,
        out_specs=out_spec,
        compiler_params=_compiler_params(1),
        cost_estimate=cost,
    )(*args)


def linear_residual(x, w, b, res):
    """res + x @ w + b, fused residual epilogue."""
    M, K = x.shape
    N = w.shape[1]
    tm = _row_tile(M)
    cost = pl.CostEstimate(flops=2 * M * K * N, transcendentals=0,
                           bytes_accessed=4 * M * K + 2 * K * N + 8 * M * N)
    return pl.pallas_call(
        _linear_residual_kernel,
        out_shape=jax.ShapeDtypeStruct((M, N), jnp.float32),
        grid=(pl.cdiv(M, tm),),
        in_specs=[pl.BlockSpec((tm, K), lambda i: (i, 0)),
                  pl.BlockSpec((K, N), lambda i: (0, 0)),
                  pl.BlockSpec((1, N), lambda i: (0, 0)),
                  pl.BlockSpec((tm, N), lambda i: (i, 0))],
        out_specs=pl.BlockSpec((tm, N), lambda i: (i, 0)),
        compiler_params=_compiler_params(1),
        cost_estimate=cost,
    )(x, w, b.reshape(1, N), res)


def ln_mlp_residual(x, g, bn, w1, b1, w2, b2):
    """x + fc2(gelu(fc1(LN(x)))), all fused in one row-tiled kernel."""
    M, E = x.shape
    H = w1.shape[1]
    tm = _row_tile(M)
    cost = pl.CostEstimate(flops=4 * M * E * H, transcendentals=M * H,
                           bytes_accessed=8 * M * E + 4 * E * H)
    return pl.pallas_call(
        functools.partial(_ln_mlp_residual_kernel, eps=_LN_EPS),
        out_shape=jax.ShapeDtypeStruct((M, E), jnp.float32),
        grid=(pl.cdiv(M, tm),),
        in_specs=[pl.BlockSpec((tm, E), lambda i: (i, 0)),
                  pl.BlockSpec((1, E), lambda i: (0, 0)),
                  pl.BlockSpec((1, E), lambda i: (0, 0)),
                  pl.BlockSpec((E, H), lambda i: (0, 0)),
                  pl.BlockSpec((1, H), lambda i: (0, 0)),
                  pl.BlockSpec((H, E), lambda i: (0, 0)),
                  pl.BlockSpec((1, E), lambda i: (0, 0))],
        out_specs=pl.BlockSpec((tm, E), lambda i: (i, 0)),
        compiler_params=_compiler_params(1),
        cost_estimate=cost,
    )(x, g.reshape(1, E), bn.reshape(1, E), w1, b1.reshape(1, H), w2, b2.reshape(1, E))


def attention(qkv, *, n_heads):
    """qkv: (B, T, 3E) -> (B, T, E). Per-batch grid; heads sliced in-kernel so
    the score matrix is a per-head (T, T) tile (never the (B*H, T, T) slab)."""
    B, T, threeE = qkv.shape
    E = threeE // 3
    dh = E // n_heads
    scale = 1.0 / math.sqrt(dh)
    cost = pl.CostEstimate(flops=4 * B * n_heads * T * T * dh,
                           transcendentals=B * n_heads * T * T,
                           bytes_accessed=4 * B * T * (threeE + E))
    return pl.pallas_call(
        functools.partial(_attention_kernel, n_heads=n_heads, scale=scale),
        out_shape=jax.ShapeDtypeStruct((B, T, E), jnp.float32),
        grid=(B,),
        in_specs=[pl.BlockSpec((1, T, threeE), lambda b: (b, 0, 0))],
        out_specs=pl.BlockSpec((1, T, E), lambda b: (b, 0, 0)),
        compiler_params=_compiler_params(1),
        cost_estimate=cost,
    )(qkv)


# ------------------------------------------------------------------
# Parameter init (mirrors _init_parameters: trunc_normal(0.02) for Linear/Conv
# weights, zeros for biases, ones/zeros for LayerNorm). Matmul weights stored
# bf16 (halves weight DMA; f32 accumulation preserved in-kernel).
# ------------------------------------------------------------------

def init_params(key, *, input_dim, patch, embed_dim, depth, n_heads,
                mlp_ratio, n_classes, n_tokens):
    ph, pw = patch
    hidden = int(embed_dim * mlp_ratio)
    keys = iter(jax.random.split(key, 16 + depth * 8))

    def tn(shape, dtype=jnp.bfloat16):
        w = 0.02 * jax.random.truncated_normal(next(keys), -2.0, 2.0, shape, jnp.float32)
        return w.astype(dtype)

    params = {
        # Conv2d(input_dim, embed_dim, kernel=stride=patch) as a matmul weight:
        # (C*ph*pw, embed_dim); patch-vector ordering (c, dy, dx) matches
        # weight.reshape(embed_dim, -1).T
        "patch_w": tn((input_dim * ph * pw, embed_dim)),
        "patch_b": jnp.zeros((embed_dim,), jnp.float32),
        "cls_token": tn((1, 1, embed_dim), jnp.float32),
        "pos_embed": tn((1, n_tokens, embed_dim), jnp.float32),
        "norm_g": jnp.ones((embed_dim,), jnp.float32),
        "norm_b": jnp.zeros((embed_dim,), jnp.float32),
        "cls_w": tn((embed_dim, n_classes)),
        "cls_b": jnp.zeros((n_classes,), jnp.float32),
        "layers": [],
    }
    for _ in range(depth):
        params["layers"].append({
            "ln1_g": jnp.ones((embed_dim,), jnp.float32),
            "ln1_b": jnp.zeros((embed_dim,), jnp.float32),
            "qkv_w": tn((embed_dim, 3 * embed_dim)),
            "qkv_b": jnp.zeros((3 * embed_dim,), jnp.float32),
            "proj_w": tn((embed_dim, embed_dim)),
            "proj_b": jnp.zeros((embed_dim,), jnp.float32),
            "ln2_g": jnp.ones((embed_dim,), jnp.float32),
            "ln2_b": jnp.zeros((embed_dim,), jnp.float32),
            "fc1_w": tn((embed_dim, hidden)),
            "fc1_b": jnp.zeros((hidden,), jnp.float32),
            "fc2_w": tn((hidden, embed_dim)),
            "fc2_b": jnp.zeros((embed_dim,), jnp.float32),
        })
    return params


# ------------------------------------------------------------------
# Forward pass (glue in plain JAX, all heavy compute in fused Pallas kernels)
# ------------------------------------------------------------------

def encoder_layer(x_tok, lp, *, n_heads):
    B, T, E = x_tok.shape
    x2 = x_tok.reshape(B * T, E)

    # --- MHSA branch: y, _ = attn(norm1(x)); x = x + y (LayerScale/DropPath = Identity)
    qkv = linear(x2, lp["qkv_w"], lp["qkv_b"], ln=(lp["ln1_g"], lp["ln1_b"]))   # LN1+QKV fused
    attn_out = attention(qkv.reshape(B, T, 3 * E), n_heads=n_heads).reshape(B * T, E)
    x2 = linear_residual(attn_out, lp["proj_w"], lp["proj_b"], x2)              # proj+residual fused

    # --- MLP branch: x = x + mlp(norm2(x)) — LN2+fc1+GELU+fc2+residual fused.
    x2 = ln_mlp_residual(x2, lp["ln2_g"], lp["ln2_b"],
                         lp["fc1_w"], lp["fc1_b"], lp["fc2_w"], lp["fc2_b"])
    return x2.reshape(B, T, E)


def vit_forward(params, x, *, patch, n_heads):
    """x: (B, C, H, W) NCHW -> logits (B, n_classes)."""
    B, C, H, W = x.shape
    ph, pw = patch
    nH, nW = H // ph, W // pw
    E = params["patch_w"].shape[1]

    # Patch embedding: Conv2d(k=stride=patch) == im2col + matmul.
    xp = (x.reshape(B, C, nH, ph, nW, pw)
            .transpose(0, 2, 4, 1, 3, 5)              # (B, nH, nW, C, ph, pw)
            .reshape(B * nH * nW, C * ph * pw))
    tokens = linear(xp, params["patch_w"], params["patch_b"]).reshape(B, nH * nW, E)

    # cls token + positional embedding.
    cls = jnp.broadcast_to(params["cls_token"], (B, 1, E))
    x_tok = jnp.concatenate([cls, tokens], axis=1)    # (B, T, E)
    # TODO(synk): PosEmbedder source not provided; using a learned additive
    # positional embedding (dropout is an eval-mode no-op).
    x_tok = x_tok + params["pos_embed"][:, : x_tok.shape[1], :]

    for lp in params["layers"]:
        x_tok = encoder_layer(x_tok, lp, n_heads=n_heads)

    # Final LayerNorm is per-token and only the cls token feeds the classifier,
    # so LN + classifier are fused over just the (B, E) cls rows.
    cls_rows = x_tok[:, 0, :]
    return linear(cls_rows, params["cls_w"], params["cls_b"],
                  ln=(params["norm_g"], params["norm_b"]))


# ------------------------------------------------------------------

if __name__ == "__main__":
    # Small config consistent with the module:
    #   ViT(patch_shape=4, input_dim=4, embed_dim=32, n_classes=8, depth=2,
    #       n_heads=4, mlp_ratio=4.0) in eval mode.
    B, C, H, W = 2, 4, 16, 16
    patch = (4, 4)
    embed_dim, depth, n_heads, mlp_ratio, n_classes = 32, 2, 4, 4.0, 8
    n_tokens = (H // patch[0]) * (W // patch[1]) + 1   # 16 patches + cls

    key = jax.random.PRNGKey(0)
    kp, kx = jax.random.split(key)
    params = init_params(
        kp, input_dim=C, patch=patch, embed_dim=embed_dim, depth=depth,
        n_heads=n_heads, mlp_ratio=mlp_ratio, n_classes=n_classes,
        n_tokens=n_tokens)
    x = jax.random.normal(kx, (B, C, H, W), jnp.float32)

    fwd = jax.jit(functools.partial(vit_forward, patch=patch, n_heads=n_heads))
    logits = fwd(params, x)
    jax.block_until_ready(logits)
    assert logits.shape == (B, n_classes)
    assert bool(jnp.all(jnp.isfinite(logits)))
    print("KERNEL_OK")
</pallas_src>

<mosaic_0001>
module attributes {stable_mosaic.version = 11 : i64} {
  func.func @_linear_kernel(%arg0: i32, %arg1: memref<32x64xf32, #tpu.memory_space<vmem>>, %arg2: memref<64x32xbf16, #tpu.memory_space<vmem>>, %arg3: memref<1x32xf32, #tpu.memory_space<vmem>>, %arg4: memref<32x32xf32, #tpu.memory_space<vmem>>) attributes {dimension_semantics = [#tpu.dimension_semantics<parallel>], iteration_bounds = array<i64: 1>, scalar_prefetch = 0 : i64, scratch_operands = 0 : i64, tpu.core_type = #tpu.core_type<tc>, window_params = [{transform_indices = @transform_0, window_bounds = array<i64: 32, 64>}, {pipeline_mode = #tpu.pipeline_mode<synchronous>, transform_indices = @transform_1, window_bounds = array<i64: 64, 32>}, {pipeline_mode = #tpu.pipeline_mode<synchronous>, transform_indices = @transform_2, window_bounds = array<i64: 1, 32>}, {transform_indices = @transform_3, window_bounds = array<i64: 32, 32>}]} {
    %c0 = arith.constant 0 : index
    %c0_0 = arith.constant 0 : index
    %0 = vector.load %arg1[%c0, %c0_0] : memref<32x64xf32, #tpu.memory_space<vmem>>, vector<32x64xf32>
    %1 = arith.truncf %0 : vector<32x64xf32> to vector<32x64xbf16>
    %c0_1 = arith.constant 0 : index
    %c0_2 = arith.constant 0 : index
    %2 = vector.load %arg2[%c0_1, %c0_2] : memref<64x32xbf16, #tpu.memory_space<vmem>>, vector<64x32xbf16>
    %cst = arith.constant dense<0.000000e+00> : vector<32x32xf32>
    %3 = tpu.matmul %1, %2, %cst {dimension_numbers = #tpu.dot_dimension_numbers<[1], [0], [0], [1], [0, 0, 1, 1], [], []>} : vector<32x64xbf16>, vector<64x32xbf16>, vector<32x32xf32> -> vector<32x32xf32>
    %c0_3 = arith.constant 0 : index
    %c0_4 = arith.constant 0 : index
    %4 = vector.load %arg3[%c0_3, %c0_4] : memref<1x32xf32, #tpu.memory_space<vmem>>, vector<1x32xf32>
    %5 = vector.broadcast %4 : vector<1x32xf32> to vector<32x32xf32>
    %6 = arith.addf %3, %5 : vector<32x32xf32>
    %c0_5 = arith.constant 0 : index
    %c0_6 = arith.constant 0 : index
    %7 = vector.load %arg4[%c0_5, %c0_6] : memref<32x32xf32, #tpu.memory_space<vmem>>, vector<32x32xf32>
    tpu.vector_store %arg4[%c0_5, %c0_6], %6 {strides = array<i32>} : memref<32x32xf32, #tpu.memory_space<vmem>>, vector<32x32xf32>,
    return
  }
  func.func @transform_0(%arg0: i32) -> (i32, i32) {
    %c0_i32 = arith.constant 0 : i32
    %c0_i32_0 = arith.constant 0 : i32
    return %arg0, %c0_i32 : i32, i32
  }
  func.func @transform_1(%arg0: i32) -> (i32, i32) {
    %c0_i32 = arith.constant 0 : i32
    %c0_i32_0 = arith.constant 0 : i32
    %c0_i32_1 = arith.constant 0 : i32
    return %c0_i32, %c0_i32_0 : i32, i32
  }
  func.func @transform_2(%arg0: i32) -> (i32, i32) {
    %c0_i32 = arith.constant 0 : i32
    %c0_i32_0 = arith.constant 0 : i32
    %c0_i32_1 = arith.constant 0 : i32
    return %c0_i32, %c0_i32_0 : i32, i32
  }
  func.func @transform_3(%arg0: i32) -> (i32, i32) {
    %c0_i32 = arith.constant 0 : i32
    %c0_i32_0 = arith.constant 0 : i32
    return %arg0, %c0_i32 : i32, i32
  }
}

module attributes {stable_mosaic.version = 11 : i64} {
  func.func @_ln_linear_kernel(%arg0: i32, %arg1: memref<34x32xf32, #tpu.memory_space<vmem>>, %arg2: memref<1x32xf32, #tpu.memory_space<vmem>>, %arg3: memref<1x32xf32, #tpu.memory_space<vmem>>, %arg4: memref<32x96xbf16, #tpu.memory_space<vmem>>, %arg5: memref<1x96xf32, #tpu.memory_space<vmem>>, %arg6: memref<34x96xf32, #tpu.memory_space<vmem>>) attributes {dimension_semantics = [#tpu.dimension_semantics<parallel>], iteration_bounds = array<i64: 1>, scalar_prefetch = 0 : i64, scratch_operands = 0 : i64, tpu.core_type = #tpu.core_type<tc>, window_params = [{transform_indices = @transform_0, window_bounds = array<i64: 34, 32>}, {pipeline_mode = #tpu.pipeline_mode<synchronous>, transform_indices = @transform_1, window_bounds = array<i64: 1, 32>}, {pipeline_mode = #tpu.pipeline_mode<synchronous>, transform_indices = @transform_2, window_bounds = array<i64: 1, 32>}, {pipeline_mode = #tpu.pipeline_mode<synchronous>, transform_indices = @transform_3, window_bounds = array<i64: 32, 96>}, {pipeline_mode = #tpu.pipeline_mode<synchronous>, transform_indices = @transform_4, window_bounds = array<i64: 1, 96>}, {transform_indices = @transform_5, window_bounds = array<i64: 34, 96>}]} {
    %c0 = arith.constant 0 : index
    %c0_0 = arith.constant 0 : index
    %0 = vector.load %arg1[%c0, %c0_0] : memref<34x32xf32, #tpu.memory_space<vmem>>, vector<34x32xf32>
    %c0_1 = arith.constant 0 : index
    %c0_2 = arith.constant 0 : index
    %1 = vector.load %arg2[%c0_1, %c0_2] : memref<1x32xf32, #tpu.memory_space<vmem>>, vector<1x32xf32>
    %c0_3 = arith.constant 0 : index
    %c0_4 = arith.constant 0 : index
    %2 = vector.load %arg3[%c0_3, %c0_4] : memref<1x32xf32, #tpu.memory_space<vmem>>, vector<1x32xf32>
    %cst = arith.constant dense<0.000000e+00> : vector<34xf32>
    %3 = vector.multi_reduction <add>, %0, %cst [1] : vector<34x32xf32> to vector<34xf32>
    %4 = vector.shape_cast %3 : vector<34xf32> to vector<34x1xf32>
    %cst_5 = arith.constant 3.200000e+01 : f32
    %5 = vector.broadcast %cst_5 : f32 to vector<34x1xf32>
    %6 = arith.divf %4, %5 : vector<34x1xf32>
    %7 = vector.broadcast %6 : vector<34x1xf32> to vector<34x32xf32>
    %8 = arith.subf %0, %7 : vector<34x32xf32>
    %9 = arith.mulf %8, %8 : vector<34x32xf32>
    %cst_6 = arith.constant dense<0.000000e+00> : vector<34xf32>
    %10 = vector.multi_reduction <add>, %9, %cst_6 [1] : vector<34x32xf32> to vector<34xf32>
    %11 = vector.shape_cast %10 : vector<34xf32> to vector<34x1xf32>
    %cst_7 = arith.constant 3.200000e+01 : f32
    %12 = vector.broadcast %cst_7 : f32 to vector<34x1xf32>
    %13 = arith.divf %11, %12 : vector<34x1xf32>
    %14 = vector.broadcast %6 : vector<34x1xf32> to vector<34x32xf32>
    %15 = arith.subf %0, %14 : vector<34x32xf32>
    %cst_8 = arith.constant 9.99999997E-7 : f32
    %16 = vector.broadcast %cst_8 : f32 to vector<34x1xf32>
    %17 = arith.addf %13, %16 : vector<34x1xf32>
    %18 = math.rsqrt %17 : vector<34x1xf32>
    %19 = vector.broadcast %18 : vector<34x1xf32> to vector<34x32xf32>
    %20 = arith.mulf %15, %19 : vector<34x32xf32>
    %21 = vector.broadcast %1 : vector<1x32xf32> to vector<34x32xf32>
    %22 = arith.mulf %20, %21 : vector<34x32xf32>
    %23 = vector.broadcast %2 : vector<1x32xf32> to vector<34x32xf32>
    %24 = arith.addf %22, %23 : vector<34x32xf32>
    %25 = arith.truncf %24 : vector<34x32xf32> to vector<34x32xbf16>
    %c0_9 = arith.constant 0 : index
    %c0_10 = arith.constant 0 : index
    %26 = vector.load %arg4[%c0_9, %c0_10] : memref<32x96xbf16, #tpu.memory_space<vmem>>, vector<32x96xbf16>
    %cst_11 = arith.constant dense<0.000000e+00> : vector<34x96xf32>
    %27 = tpu.matmul %25, %26, %cst_11 {dimension_numbers = #tpu.dot_dimension_numbers<[1], [0], [0], [1], [0, 0, 1, 1], [], []>} : vector<34x32xbf16>, vector<32x96xbf16>, vector<34x96xf32> -> vector<34x96xf32>
    %c0_12 = arith.constant 0 : index
    %c0_13 = arith.constant 0 : index
    %28 = vector.load %arg5[%c0_12, %c0_13] : memref<1x96xf32, #tpu.memory_space<vmem>>, vector<1x96xf32>
    %29 = vector.broadcast %28 : vector<1x96xf32> to vector<34x96xf32>
    %30 = arith.addf %27, %29 : vector<34x96xf32>
    %c0_14 = arith.constant 0 : index
    %c0_15 = arith.constant 0 : index
    %31 = vector.load %arg6[%c0_14, %c0_15] : memref<34x96xf32, #tpu.memory_space<vmem>>, vector<34x96xf32>
    tpu.vector_store %arg6[%c0_14, %c0_15], %30 {strides = array<i32>} : memref<34x96xf32, #tpu.memory_space<vmem>>, vector<34x96xf32>,
    return
  }
  func.func @transform_0(%arg0: i32) -> (i32, i32) {
    %c0_i32 = arith.constant 0 : i32
    %c0_i32_0 = arith.constant 0 : i32
    return %arg0, %c0_i32 : i32, i32
  }
  func.func @transform_1(%arg0: i32) -> (i32, i32) {
    %c0_i32 = arith.constant 0 : i32
    %c0_i32_0 = arith.constant 0 : i32
    %c0_i32_1 = arith.constant 0 : i32
    return %c0_i32, %c0_i32_0 : i32, i32
  }
  func.func @transform_2(%arg0: i32) -> (i32, i32) {
    %c0_i32 = arith.constant 0 : i32
    %c0_i32_0 = arith.constant 0 : i32
    %c0_i32_1 = arith.constant 0 : i32
    return %c0_i32, %c0_i32_0 : i32, i32
  }
  func.func @transform_3(%arg0: i32) -> (i32, i32) {
    %c0_i32 = arith.constant 0 : i32
    %c0_i32_0 = arith.constant 0 : i32
    %c0_i32_1 = arith.constant 0 : i32
    return %c0_i32, %c0_i32_0 : i32, i32
  }
  func.func @transform_4(%arg0: i32) -> (i32, i32) {
    %c0_i32 = arith.constant 0 : i32
    %c0_i32_0 = arith.constant 0 : i32
    %c0_i32_1 = arith.constant 0 : i32
    return %c0_i32, %c0_i32_0 : i32, i32
  }
  func.func @transform_5(%arg0: i32) -> (i32, i32) {
    %c0_i32 = arith.constant 0 : i32
    %c0_i32_0 = arith.constant 0 : i32
    return %arg0, %c0_i32 : i32, i32
  }
}

module attributes {stable_mosaic.version = 11 : i64} {
  func.func @_attention_kernel(%arg0: i32, %arg1: memref<1x17x96xf32, #tpu.memory_space<vmem>>, %arg2: memref<1x17x32xf32, #tpu.memory_space<vmem>>) attributes {dimension_semantics = [#tpu.dimension_semantics<parallel>], iteration_bounds = array<i64: 2>, scalar_prefetch = 0 : i64, scratch_operands = 0 : i64, tpu.core_type = #tpu.core_type<tc>, window_params = [{transform_indices = @transform_0, window_bounds = array<i64: 1, 17, 96>}, {transform_indices = @transform_1, window_bounds = array<i64: 1, 17, 32>}]} {
    %c0 = arith.constant 0 : index
    %c0_0 = arith.constant 0 : index
    %c0_1 = arith.constant 0 : index
    %0 = vector.load %arg1[%c0, %c0_0, %c0_1] : memref<1x17x96xf32, #tpu.memory_space<vmem>>, vector<1x17x96xf32>
    %1 = vector.shape_cast %0 : vector<1x17x96xf32> to vector<17x96xf32>
    %2 = vector.extract_strided_slice %1 {offsets = [0, 0], sizes = [17, 8], strides = [1, 1]} : vector<17x96xf32> to vector<17x8xf32>
    %cst = arith.constant 0.353553385 : f32
    %3 = vector.broadcast %cst : f32 to vector<17x8xf32>
    %4 = arith.mulf %2, %3 : vector<17x8xf32>
    %5 = arith.truncf %4 : vector<17x8xf32> to vector<17x8xbf16>
    %6 = vector.extract_strided_slice %1 {offsets = [0, 32], sizes = [17, 8], strides = [1, 1]} : vector<17x96xf32> to vector<17x8xf32>
    %7 = arith.truncf %6 : vector<17x8xf32> to vector<17x8xbf16>
    %8 = vector.extract_strided_slice %1 {offsets = [0, 64], sizes = [17, 8], strides = [1, 1]} : vector<17x96xf32> to vector<17x8xf32>
    %9 = arith.truncf %8 : vector<17x8xf32> to vector<17x8xbf16>
    %10 = tpu.transpose %7, [1, 0] : vector<17x8xbf16> -> vector<8x17xbf16>
    %cst_2 = arith.constant dense<0.000000e+00> : vector<17x17xf32>
    %11 = tpu.matmul %5, %10, %cst_2 {dimension_numbers = #tpu.dot_dimension_numbers<[1], [0], [0], [1], [0, 0, 1, 1], [], []>} : vector<17x8xbf16>, vector<8x17xbf16>, vector<17x17xf32> -> vector<17x17xf32>
    %cst_3 = arith.constant dense<0xFF800000> : vector<17xf32>
    %12 = vector.multi_reduction <maximumf>, %11, %cst_3 [1] : vector<17x17xf32> to vector<17xf32>
    %13 = vector.shape_cast %12 : vector<17xf32> to vector<17x1xf32>
    %14 = vector.broadcast %13 : vector<17x1xf32> to vector<17x17xf32>
    %15 = arith.subf %11, %14 : vector<17x17xf32>
    %16 = math.exp %15 : vector<17x17xf32>
    %cst_4 = arith.constant dense<0.000000e+00> : vector<17xf32>
    %17 = vector.multi_reduction <add>, %16, %cst_4 [1] : vector<17x17xf32> to vector<17xf32>
    %18 = vector.shape_cast %17 : vector<17xf32> to vector<17x1xf32>
    %19 = tpu.reciprocal %18 {approx = true} : vector<17x1xf32> -> vector<17x1xf32>
    %20 = vector.broadcast %19 : vector<17x1xf32> to vector<17x17xf32>
    %21 = arith.mulf %16, %20 : vector<17x17xf32>
    %22 = arith.truncf %21 : vector<17x17xf32> to vector<17x17xbf16>
    %cst_5 = arith.constant dense<0.000000e+00> : vector<17x8xf32>
    %23 = tpu.matmul %22, %9, %cst_5 {dimension_numbers = #tpu.dot_dimension_numbers<[1], [0], [0], [1], [0, 0, 1, 1], [], []>} : vector<17x17xbf16>, vector<17x8xbf16>, vector<17x8xf32> -> vector<17x8xf32>
    %24 = vector.extract_strided_slice %1 {offsets = [0, 8], sizes = [17, 8], strides = [1, 1]} : vector<17x96xf32> to vector<17x8xf32>
    %cst_6 = arith.constant 0.353553385 : f32
    %25 = vector.broadcast %cst_6 : f32 to vector<17x8xf32>
    %26 = arith.mulf %24, %25 : vector<17x8xf32>
    %27 = arith.truncf %26 : vector<17x8xf32> to vector<17x8xbf16>
    %28 = vector.extract_strided_slice %1 {offsets = [0, 40], sizes = [17, 8], strides = [1, 1]} : vector<17x96xf32> to vector<17x8xf32>
    %29 = arith.truncf %28 : vector<17x8xf32> to vector<17x8xbf16>
    %30 = vector.extract_strided_slice %1 {offsets = [0, 72], sizes = [17, 8], strides = [1, 1]} : vector<17x96xf32> to vector<17x8xf32>
    %31 = arith.truncf %30 : vector<17x8xf32> to vector<17x8xbf16>
    %32 = tpu.transpose %29, [1, 0] : vector<17x8xbf16> -> vector<8x17xbf16>
    %cst_7 = arith.constant dense<0.000000e+00> : vector<17x17xf32>
    %33 = tpu.matmul %27, %32, %cst_7 {dimension_numbers = #tpu.dot_dimension_numbers<[1], [0], [0], [1], [0, 0, 1, 1], [], []>} : vector<17x8xbf16>, vector<8x17xbf16>, vector<17x17xf32> -> vector<17x17xf32>
    %cst_8 = arith.constant dense<0xFF800000> : vector<17xf32>
    %34 = vector.multi_reduction <maximumf>, %33, %cst_8 [1] : vector<17x17xf32> to vector<17xf32>
    %35 = vector.shape_cast %34 : vector<17xf32> to vector<17x1xf32>
    %36 = vector.broadcast %35 : vector<17x1xf32> to vector<17x17xf32>
    %37 = arith.subf %33, %36 : vector<17x17xf32>
    %38 = math.exp %37 : vector<17x17xf32>
    %cst_9 = arith.constant dense<0.000000e+00> : vector<17xf32>
    %39 = vector.multi_reduction <add>, %38, %cst_9 [1] : vector<17x17xf32> to vector<17xf32>
    %40 = vector.shape_cast %39 : vector<17xf32> to vector<17x1xf32>
    %41 = tpu.reciprocal %40 {approx = true} : vector<17x1xf32> -> vector<17x1xf32>
    %42 = vector.broadcast %41 : vector<17x1xf32> to vector<17x17xf32>
    %43 = arith.mulf %38, %42 : vector<17x17xf32>
    %44 = arith.truncf %43 : vector<17x17xf32> to vector<17x17xbf16>
    %cst_10 = arith.constant dense<0.000000e+00> : vector<17x8xf32>
    %45 = tpu.matmul %44, %31, %cst_10 {dimension_numbers = #tpu.dot_dimension_numbers<[1], [0], [0], [1], [0, 0, 1, 1], [], []>} : vector<17x17xbf16>, vector<17x8xbf16>, vector<17x8xf32> -> vector<17x8xf32>
    %46 = vector.extract_strided_slice %1 {offsets = [0, 16], sizes = [17, 8], strides = [1, 1]} : vector<17x96xf32> to vector<17x8xf32>
    %cst_11 = arith.constant 0.353553385 : f32
    %47 = vector.broadcast %cst_11 : f32 to vector<17x8xf32>
    %48 = arith.mulf %46, %47 : vector<17x8xf32>
    %49 = arith.truncf %48 : vector<17x8xf32> to vector<17x8xbf16>
    %50 = vector.extract_strided_slice %1 {offsets = [0, 48], sizes = [17, 8], strides = [1, 1]} : vector<17x96xf32> to vector<17x8xf32>
    %51 = arith.truncf %50 : vector<17x8xf32> to vector<17x8xbf16>
    %52 = vector.extract_strided_slice %1 {offsets = [0, 80], sizes = [17, 8], strides = [1, 1]} : vector<17x96xf32> to vector<17x8xf32>
    %53 = arith.truncf %52 : vector<17x8xf32> to vector<17x8xbf16>
    %54 = tpu.transpose %51, [1, 0] : vector<17x8xbf16> -> vector<8x17xbf16>
    %cst_12 = arith.constant dense<0.000000e+00> : vector<17x17xf32>
    %55 = tpu.matmul %49, %54, %cst_12 {dimension_numbers = #tpu.dot_dimension_numbers<[1], [0], [0], [1], [0, 0, 1, 1], [], []>} : vector<17x8xbf16>, vector<8x17xbf16>, vector<17x17xf32> -> vector<17x17xf32>
    %cst_13 = arith.constant dense<0xFF800000> : vector<17xf32>
    %56 = vector.multi_reduction <maximumf>, %55, %cst_13 [1] : vector<17x17xf32> to vector<17xf32>
    %57 = vector.shape_cast %56 : vector<17xf32> to vector<17x1xf32>
    %58 = vector.broadcast %57 : vector<17x1xf32> to vector<17x17xf32>
    %59 = arith.subf %55, %58 : vector<17x17xf32>
    %60 = math.exp %59 : vector<17x17xf32>
    %cst_14 = arith.constant dense<0.000000e+00> : vector<17xf32>
    %61 = vector.multi_reduction <add>, %60, %cst_14 [1] : vector<17x17xf32> to vector<17xf32>
    %62 = vector.shape_cast %61 : vector<17xf32> to vector<17x1xf32>
    %63 = tpu.reciprocal %62 {approx = true} : vector<17x1xf32> -> vector<17x1xf32>
    %64 = vector.broadcast %63 : vector<17x1xf32> to vector<17x17xf32>
    %65 = arith.mulf %60, %64 : vector<17x17xf32>
    %66 = arith.truncf %65 : vector<17x17xf32> to vector<17x17xbf16>
    %cst_15 = arith.constant dense<0.000000e+00> : vector<17x8xf32>
    %67 = tpu.matmul %66, %53, %cst_15 {dimension_numbers = #tpu.dot_dimension_numbers<[1], [0], [0], [1], [0, 0, 1, 1], [], []>} : vector<17x17xbf16>, vector<17x8xbf16>, vector<17x8xf32> -> vector<17x8xf32>
    %68 = vector.extract_strided_slice %1 {offsets = [0, 24], sizes = [17, 8], strides = [1, 1]} : vector<17x96xf32> to vector<17x8xf32>
    %cst_16 = arith.constant 0.353553385 : f32
    %69 = vector.broadcast %cst_16 : f32 to vector<17x8xf32>
    %70 = arith.mulf %68, %69 : vector<17x8xf32>
    %71 = arith.truncf %70 : vector<17x8xf32> to vector<17x8xbf16>
    %72 = vector.extract_strided_slice %1 {offsets = [0, 56], sizes = [17, 8], strides = [1, 1]} : vector<17x96xf32> to vector<17x8xf32>
    %73 = arith.truncf %72 : vector<17x8xf32> to vector<17x8xbf16>
    %74 = vector.extract_strided_slice %1 {offsets = [0, 88], sizes = [17, 8], strides = [1, 1]} : vector<17x96xf32> to vector<17x8xf32>
    %75 = arith.truncf %74 : vector<17x8xf32> to vector<17x8xbf16>
    %76 = tpu.transpose %73, [1, 0] : vector<17x8xbf16> -> vector<8x17xbf16>
    %cst_17 = arith.constant dense<0.000000e+00> : vector<17x17xf32>
    %77 = tpu.matmul %71, %76, %cst_17 {dimension_numbers = #tpu.dot_dimension_numbers<[1], [0], [0], [1], [0, 0, 1, 1], [], []>} : vector<17x8xbf16>, vector<8x17xbf16>, vector<17x17xf32> -> vector<17x17xf32>
    %cst_18 = arith.constant dense<0xFF800000> : vector<17xf32>
    %78 = vector.multi_reduction <maximumf>, %77, %cst_18 [1] : vector<17x17xf32> to vector<17xf32>
    %79 = vector.shape_cast %78 : vector<17xf32> to vector<17x1xf32>
    %80 = vector.broadcast %79 : vector<17x1xf32> to vector<17x17xf32>
    %81 = arith.subf %77, %80 : vector<17x17xf32>
    %82 = math.exp %81 : vector<17x17xf32>
    %cst_19 = arith.constant dense<0.000000e+00> : vector<17xf32>
    %83 = vector.multi_reduction <add>, %82, %cst_19 [1] : vector<17x17xf32> to vector<17xf32>
    %84 = vector.shape_cast %83 : vector<17xf32> to vector<17x1xf32>
    %85 = tpu.reciprocal %84 {approx = true} : vector<17x1xf32> -> vector<17x1xf32>
    %86 = vector.broadcast %85 : vector<17x1xf32> to vector<17x17xf32>
    %87 = arith.mulf %82, %86 : vector<17x17xf32>
    %88 = arith.truncf %87 : vector<17x17xf32> to vector<17x17xbf16>
    %cst_20 = arith.constant dense<0.000000e+00> : vector<17x8xf32>
    %89 = tpu.matmul %88, %75, %cst_20 {dimension_numbers = #tpu.dot_dimension_numbers<[1], [0], [0], [1], [0, 0, 1, 1], [], []>} : vector<17x17xbf16>, vector<17x8xbf16>, vector<17x8xf32> -> vector<17x8xf32>
    %90 = tpu.concatenate %23, %45, %67, %89 in 1 : vector<17x8xf32>, vector<17x8xf32>, vector<17x8xf32>, vector<17x8xf32> -> vector<17x32xf32>
    %c0_21 = arith.constant 0 : index
    %c0_22 = arith.constant 0 : index
    %c0_23 = arith.constant 0 : index
    %91 = vector.load %arg2[%c0_21, %c0_22, %c0_23] : memref<1x17x32xf32, #tpu.memory_space<vmem>>, vector<1x17x32xf32>
    %92 = vector.shape_cast %91 : vector<1x17x32xf32> to vector<17x32xf32>
    %93 = vector.shape_cast %90 : vector<17x32xf32> to vector<1x17x32xf32>
    tpu.vector_store %arg2[%c0_21, %c0_22, %c0_23], %93 {strides = array<i32>} : memref<1x17x32xf32, #tpu.memory_space<vmem>>, vector<1x17x32xf32>,
    return
  }
  func.func @transform_0(%arg0: i32) -> (i32, i32, i32) {
    %c0_i32 = arith.constant 0 : i32
    %c0_i32_0 = arith.constant 0 : i32
    %c0_i32_1 = arith.constant 0 : i32
    return %arg0, %c0_i32, %c0_i32_0 : i32, i32, i32
  }
  func.func @transform_1(%arg0: i32) -> (i32, i32, i32) {
    %c0_i32 = arith.constant 0 : i32
    %c0_i32_0 = arith.constant 0 : i32
    %c0_i32_1 = arith.constant 0 : i32
    return %arg0, %c0_i32, %c0_i32_0 : i32, i32, i32
  }
}

module attributes {stable_mosaic.version = 11 : i64} {
  func.func @_linear_residual_kernel(%arg0: i32, %arg1: memref<34x32xf32, #tpu.memory_space<vmem>>, %arg2: memref<32x32xbf16, #tpu.memory_space<vmem>>, %arg3: memref<1x32xf32, #tpu.memory_space<vmem>>, %arg4: memref<34x32xf32, #tpu.memory_space<vmem>>, %arg5: memref<34x32xf32, #tpu.memory_space<vmem>>) attributes {dimension_semantics = [#tpu.dimension_semantics<parallel>], iteration_bounds = array<i64: 1>, scalar_prefetch = 0 : i64, scratch_operands = 0 : i64, tpu.core_type = #tpu.core_type<tc>, window_params = [{transform_indices = @transform_0, window_bounds = array<i64: 34, 32>}, {pipeline_mode = #tpu.pipeline_mode<synchronous>, transform_indices = @transform_1, window_bounds = array<i64: 32, 32>}, {pipeline_mode = #tpu.pipeline_mode<synchronous>, transform_indices = @transform_2, window_bounds = array<i64: 1, 32>}, {transform_indices = @transform_3, window_bounds = array<i64: 34, 32>}, {transform_indices = @transform_4, window_bounds = array<i64: 34, 32>}]} {
    %c0 = arith.constant 0 : index
    %c0_0 = arith.constant 0 : index
    %0 = vector.load %arg1[%c0, %c0_0] : memref<34x32xf32, #tpu.memory_space<vmem>>, vector<34x32xf32>
    %1 = arith.truncf %0 : vector<34x32xf32> to vector<34x32xbf16>
    %c0_1 = arith.constant 0 : index
    %c0_2 = arith.constant 0 : index
    %2 = vector.load %arg2[%c0_1, %c0_2] : memref<32x32xbf16, #tpu.memory_space<vmem>>, vector<32x32xbf16>
    %cst = arith.constant dense<0.000000e+00> : vector<34x32xf32>
    %3 = tpu.matmul %1, %2, %cst {dimension_numbers = #tpu.dot_dimension_numbers<[1], [0], [0], [1], [0, 0, 1, 1], [], []>} : vector<34x32xbf16>, vector<32x32xbf16>, vector<34x32xf32> -> vector<34x32xf32>
    %c0_3 = arith.constant 0 : index
    %c0_4 = arith.constant 0 : index
    %4 = vector.load %arg4[%c0_3, %c0_4] : memref<34x32xf32, #tpu.memory_space<vmem>>, vector<34x32xf32>
    %5 = arith.addf %4, %3 : vector<34x32xf32>
    %c0_5 = arith.constant 0 : index
    %c0_6 = arith.constant 0 : index
    %6 = vector.load %arg3[%c0_5, %c0_6] : memref<1x32xf32, #tpu.memory_space<vmem>>, vector<1x32xf32>
    %7 = vector.broadcast %6 : vector<1x32xf32> to vector<34x32xf32>
    %8 = arith.addf %5, %7 : vector<34x32xf32>
    %c0_7 = arith.constant 0 : index
    %c0_8 = arith.constant 0 : index
    %9 = vector.load %arg5[%c0_7, %c0_8] : memref<34x32xf32, #tpu.memory_space<vmem>>, vector<34x32xf32>
    tpu.vector_store %arg5[%c0_7, %c0_8], %8 {strides = array<i32>} : memref<34x32xf32, #tpu.memory_space<vmem>>, vector<34x32xf32>,
    return
  }
  func.func @transform_0(%arg0: i32) -> (i32, i32) {
    %c0_i32 = arith.constant 0 : i32
    %c0_i32_0 = arith.constant 0 : i32
    return %arg0, %c0_i32 : i32, i32
  }
  func.func @transform_1(%arg0: i32) -> (i32, i32) {
    %c0_i32 = arith.constant 0 : i32
    %c0_i32_0 = arith.constant 0 : i32
    %c0_i32_1 = arith.constant 0 : i32
    return %c0_i32, %c0_i32_0 : i32, i32
  }
  func.func @transform_2(%arg0: i32) -> (i32, i32) {
    %c0_i32 = arith.constant 0 : i32
    %c0_i32_0 = arith.constant 0 : i32
    %c0_i32_1 = arith.constant 0 : i32
    return %c0_i32, %c0_i32_0 : i32, i32
  }
  func.func @transform_3(%arg0: i32) -> (i32, i32) {
    %c0_i32 = arith.constant 0 : i32
    %c0_i32_0 = arith.constant 0 : i32
    return %arg0, %c0_i32 : i32, i32
  }
  func.func @transform_4(%arg0: i32) -> (i32, i32) {
    %c0_i32 = arith.constant 0 : i32
    %c0_i32_0 = arith.constant 0 : i32
    return %arg0, %c0_i32 : i32, i32
  }
}

module attributes {stable_mosaic.version = 11 : i64} {
  func.func @_ln_mlp_residual_kernel(%arg0: i32, %arg1: memref<34x32xf32, #tpu.memory_space<vmem>>, %arg2: memref<1x32xf32, #tpu.memory_space<vmem>>, %arg3: memref<1x32xf32, #tpu.memory_space<vmem>>, %arg4: memref<32x128xbf16, #tpu.memory_space<vmem>>, %arg5: memref<1x128xf32, #tpu.memory_space<vmem>>, %arg6: memref<128x32xbf16, #tpu.memory_space<vmem>>, %arg7: memref<1x32xf32, #tpu.memory_space<vmem>>, %arg8: memref<34x32xf32, #tpu.memory_space<vmem>>) attributes {dimension_semantics = [#tpu.dimension_semantics<parallel>], iteration_bounds = array<i64: 1>, scalar_prefetch = 0 : i64, scratch_operands = 0 : i64, tpu.core_type = #tpu.core_type<tc>, window_params = [{transform_indices = @transform_0, window_bounds = array<i64: 34, 32>}, {pipeline_mode = #tpu.pipeline_mode<synchronous>, transform_indices = @transform_1, window_bounds = array<i64: 1, 32>}, {pipeline_mode = #tpu.pipeline_mode<synchronous>, transform_indices = @transform_2, window_bounds = array<i64: 1, 32>}, {pipeline_mode = #tpu.pipeline_mode<synchronous>, transform_indices = @transform_3, window_bounds = array<i64: 32, 128>}, {pipeline_mode = #tpu.pipeline_mode<synchronous>, transform_indices = @transform_4, window_bounds = array<i64: 1, 128>}, {pipeline_mode = #tpu.pipeline_mode<synchronous>, transform_indices = @transform_5, window_bounds = array<i64: 128, 32>}, {pipeline_mode = #tpu.pipeline_mode<synchronous>, transform_indices = @transform_6, window_bounds = array<i64: 1, 32>}, {transform_indices = @transform_7, window_bounds = array<i64: 34, 32>}]} {
    %c0 = arith.constant 0 : index
    %c0_0 = arith.constant 0 : index
    %0 = vector.load %arg1[%c0, %c0_0] : memref<34x32xf32, #tpu.memory_space<vmem>>, vector<34x32xf32>
    %c0_1 = arith.constant 0 : index
    %c0_2 = arith.constant 0 : index
    %1 = vector.load %arg2[%c0_1, %c0_2] : memref<1x32xf32, #tpu.memory_space<vmem>>, vector<1x32xf32>
    %c0_3 = arith.constant 0 : index
    %c0_4 = arith.constant 0 : index
    %2 = vector.load %arg3[%c0_3, %c0_4] : memref<1x32xf32, #tpu.memory_space<vmem>>, vector<1x32xf32>
    %cst = arith.constant dense<0.000000e+00> : vector<34xf32>
    %3 = vector.multi_reduction <add>, %0, %cst [1] : vector<34x32xf32> to vector<34xf32>
    %4 = vector.shape_cast %3 : vector<34xf32> to vector<34x1xf32>
    %cst_5 = arith.constant 3.200000e+01 : f32
    %5 = vector.broadcast %cst_5 : f32 to vector<34x1xf32>
    %6 = arith.divf %4, %5 : vector<34x1xf32>
    %7 = vector.broadcast %6 : vector<34x1xf32> to vector<34x32xf32>
    %8 = arith.subf %0, %7 : vector<34x32xf32>
    %9 = arith.mulf %8, %8 : vector<34x32xf32>
    %cst_6 = arith.constant dense<0.000000e+00> : vector<34xf32>
    %10 = vector.multi_reduction <add>, %9, %cst_6 [1] : vector<34x32xf32> to vector<34xf32>
    %11 = vector.shape_cast %10 : vector<34xf32> to vector<34x1xf32>
    %cst_7 = arith.constant 3.200000e+01 : f32
    %12 = vector.broadcast %cst_7 : f32 to vector<34x1xf32>
    %13 = arith.divf %11, %12 : vector<34x1xf32>
    %14 = vector.broadcast %6 : vector<34x1xf32> to vector<34x32xf32>
    %15 = arith.subf %0, %14 : vector<34x32xf32>
    %cst_8 = arith.constant 9.99999997E-7 : f32
    %16 = vector.broadcast %cst_8 : f32 to vector<34x1xf32>
    %17 = arith.addf %13, %16 : vector<34x1xf32>
    %18 = math.rsqrt %17 : vector<34x1xf32>
    %19 = vector.broadcast %18 : vector<34x1xf32> to vector<34x32xf32>
    %20 = arith.mulf %15, %19 : vector<34x32xf32>
    %21 = vector.broadcast %1 : vector<1x32xf32> to vector<34x32xf32>
    %22 = arith.mulf %20, %21 : vector<34x32xf32>
    %23 = vector.broadcast %2 : vector<1x32xf32> to vector<34x32xf32>
    %24 = arith.addf %22, %23 : vector<34x32xf32>
    %25 = arith.truncf %24 : vector<34x32xf32> to vector<34x32xbf16>
    %c0_9 = arith.constant 0 : index
    %c0_10 = arith.constant 0 : index
    %26 = vector.load %arg4[%c0_9, %c0_10] : memref<32x128xbf16, #tpu.memory_space<vmem>>, vector<32x128xbf16>
    %cst_11 = arith.constant dense<0.000000e+00> : vector<34x128xf32>
    %27 = tpu.matmul %25, %26, %cst_11 {dimension_numbers = #tpu.dot_dimension_numbers<[1], [0], [0], [1], [0, 0, 1, 1], [], []>} : vector<34x32xbf16>, vector<32x128xbf16>, vector<34x128xf32> -> vector<34x128xf32>
    %c0_12 = arith.constant 0 : index
    %c0_13 = arith.constant 0 : index
    %28 = vector.load %arg5[%c0_12, %c0_13] : memref<1x128xf32, #tpu.memory_space<vmem>>, vector<1x128xf32>
    %29 = vector.broadcast %28 : vector<1x128xf32> to vector<34x128xf32>
    %30 = arith.addf %27, %29 : vector<34x128xf32>
    %cst_14 = arith.constant 5.000000e-01 : f32
    %31 = vector.broadcast %cst_14 : f32 to vector<34x128xf32>
    %32 = arith.mulf %31, %30 : vector<34x128xf32>
    %cst_15 = arith.constant 0.707106769 : f32
    %33 = vector.broadcast %cst_15 : f32 to vector<34x128xf32>
    %34 = arith.mulf %30, %33 : vector<34x128xf32>
    %35 = math.absf %34 : vector<34x128xf32>
    %cst_16 = arith.constant 0.327591091 : f32
    %36 = vector.broadcast %cst_16 : f32 to vector<34x128xf32>
    %37 = arith.mulf %36, %35 : vector<34x128xf32>
    %cst_17 = arith.constant 1.000000e+00 : f32
    %38 = vector.broadcast %cst_17 : f32 to vector<34x128xf32>
    %39 = arith.addf %38, %37 : vector<34x128xf32>
    %cst_18 = arith.constant 1.000000e+00 : f32
    %40 = vector.broadcast %cst_18 : f32 to vector<34x128xf32>
    %41 = arith.divf %40, %39 : vector<34x128xf32>
    %cst_19 = arith.constant 1.06140542 : f32
    %42 = vector.broadcast %cst_19 : f32 to vector<34x128xf32>
    %43 = arith.mulf %41, %42 : vector<34x128xf32>
    %cst_20 = arith.constant -1.45315206 : f32
    %44 = vector.broadcast %cst_20 : f32 to vector<34x128xf32>
    %45 = arith.addf %44, %43 : vector<34x128xf32>
    %46 = arith.mulf %41, %45 : vector<34x128xf32>
    %cst_21 = arith.constant 1.42141378 : f32
    %47 = vector.broadcast %cst_21 : f32 to vector<34x128xf32>
    %48 = arith.addf %47, %46 : vector<34x128xf32>
    %49 = arith.mulf %41, %48 : vector<34x128xf32>
    %cst_22 = arith.constant -0.284496725 : f32
    %50 = vector.broadcast %cst_22 : f32 to vector<34x128xf32>
    %51 = arith.addf %50, %49 : vector<34x128xf32>
    %52 = arith.mulf %41, %51 : vector<34x128xf32>
    %cst_23 = arith.constant 0.254829586 : f32
    %53 = vector.broadcast %cst_23 : f32 to vector<34x128xf32>
    %54 = arith.addf %53, %52 : vector<34x128xf32>
    %55 = arith.mulf %41, %54 : vector<34x128xf32>
    %cst_24 = arith.constant 0.000000e+00 : f32
    %56 = vector.broadcast %cst_24 : f32 to vector<34x128xf32>
    %57 = arith.subf %56, %35 : vector<34x128xf32>
    %58 = arith.mulf %57, %35 : vector<34x128xf32>
    %59 = math.exp %58 : vector<34x128xf32>
    %60 = arith.mulf %55, %59 : vector<34x128xf32>
    %cst_25 = arith.constant 1.000000e+00 : f32
    %61 = vector.broadcast %cst_25 : f32 to vector<34x128xf32>
    %62 = arith.subf %61, %60 : vector<34x128xf32>
    %cst_26 = arith.constant 0.000000e+00 : f32
    %63 = vector.broadcast %cst_26 : f32 to vector<34x128xf32>
    %64 = arith.cmpf oge, %34, %63 : vector<34x128xf32>
    %cst_27 = arith.constant 0.000000e+00 : f32
    %65 = vector.broadcast %cst_27 : f32 to vector<34x128xf32>
    %66 = arith.subf %65, %62 : vector<34x128xf32>
    %67 = arith.select %64, %62, %66 : vector<34x128xi1>, vector<34x128xf32>
    %cst_28 = arith.constant 1.000000e+00 : f32
    %68 = vector.broadcast %cst_28 : f32 to vector<34x128xf32>
    %69 = arith.addf %68, %67 : vector<34x128xf32>
    %70 = arith.mulf %32, %69 : vector<34x128xf32>
    %71 = arith.truncf %70 : vector<34x128xf32> to vector<34x128xbf16>
    %c0_29 = arith.constant 0 : index
    %c0_30 = arith.constant 0 : index
    %72 = vector.load %arg6[%c0_29, %c0_30] : memref<128x32xbf16, #tpu.memory_space<vmem>>, vector<128x32xbf16>
    %cst_31 = arith.constant dense<0.000000e+00> : vector<34x32xf32>
    %73 = tpu.matmul %71, %72, %cst_31 {dimension_numbers = #tpu.dot_dimension_numbers<[1], [0], [0], [1], [0, 0, 1, 1], [], []>} : vector<34x128xbf16>, vector<128x32xbf16>, vector<34x32xf32> -> vector<34x32xf32>
    %c0_32 = arith.constant 0 : index
    %c0_33 = arith.constant 0 : index
    %74 = vector.load %arg7[%c0_32, %c0_33] : memref<1x32xf32, #tpu.memory_space<vmem>>, vector<1x32xf32>
    %75 = vector.broadcast %74 : vector<1x32xf32> to vector<34x32xf32>
    %76 = arith.addf %73, %75 : vector<34x32xf32>
    %77 = arith.addf %0, %76 : vector<34x32xf32>
    %c0_34 = arith.constant 0 : index
    %c0_35 = arith.constant 0 : index
    %78 = vector.load %arg8[%c0_34, %c0_35] : memref<34x32xf32, #tpu.memory_space<vmem>>, vector<34x32xf32>
    tpu.vector_store %arg8[%c0_34, %c0_35], %77 {strides = array<i32>} : memref<34x32xf32, #tpu.memory_space<vmem>>, vector<34x32xf32>,
    return
  }
  func.func @transform_0(%arg0: i32) -> (i32, i32) {
    %c0_i32 = arith.constant 0 : i32
    %c0_i32_0 = arith.constant 0 : i32
    return %arg0, %c0_i32 : i32, i32
  }
  func.func @transform_1(%arg0: i32) -> (i32, i32) {
    %c0_i32 = arith.constant 0 : i32
    %c0_i32_0 = arith.constant 0 : i32
    %c0_i32_1 = arith.constant 0 : i32
    return %c0_i32, %c0_i32_0 : i32, i32
  }
  func.func @transform_2(%arg0: i32) -> (i32, i32) {
    %c0_i32 = arith.constant 0 : i32
    %c0_i32_0 = arith.constant 0 : i32
    %c0_i32_1 = arith.constant 0 : i32
    return %c0_i32, %c0_i32_0 : i32, i32
  }
  func.func @transform_3(%arg0: i32) -> (i32, i32) {
    %c0_i32 = arith.constant 0 : i32
    %c0_i32_0 = arith.constant 0 : i32
    %c0_i32_1 = arith.constant 0 : i32
    return %c0_i32, %c0_i32_0 : i32, i32
  }
  func.func @transform_4(%arg0: i32) -> (i32, i32) {
    %c0_i32 = arith.constant 0 : i32
    %c0_i32_0 = arith.constant 0 : i32
    %c0_i32_1 = arith.constant 0 : i32
    return %c0_i32, %c0_i32_0 : i32, i32
  }
  func.func @transform_5(%arg0: i32) -> (i32, i32) {
    %c0_i32 = arith.constant 0 : i32
    %c0_i32_0 = arith.constant 0 : i32
    %c0_i32_1 = arith.constant 0 : i32
    return %c0_i32, %c0_i32_0 : i32, i32
  }
  func.func @transform_6(%arg0: i32) -> (i32, i32) {
    %c0_i32 = arith.constant 0 : i32
    %c0_i32_0 = arith.constant 0 : i32
    %c0_i32_1 = arith.constant 0 : i32
    return %c0_i32, %c0_i32_0 : i32, i32
  }
  func.func @transform_7(%arg0: i32) -> (i32, i32) {
    %c0_i32 = arith.constant 0 : i32
    %c0_i32_0 = arith.constant 0 : i32
    return %arg0, %c0_i32 : i32, i32
  }
}

module attributes {stable_mosaic.version = 11 : i64} {
  func.func @_ln_linear_kernel(%arg0: i32, %arg1: memref<2x32xf32, #tpu.memory_space<vmem>>, %arg2: memref<1x32xf32, #tpu.memory_space<vmem>>, %arg3: memref<1x32xf32, #tpu.memory_space<vmem>>, %arg4: memref<32x8xbf16, #tpu.memory_space<vmem>>, %arg5: memref<1x8xf32, #tpu.memory_space<vmem>>, %arg6: memref<2x8xf32, #tpu.memory_space<vmem>>) attributes {dimension_semantics = [#tpu.dimension_semantics<parallel>], iteration_bounds = array<i64: 1>, scalar_prefetch = 0 : i64, scratch_operands = 0 : i64, tpu.core_type = #tpu.core_type<tc>, window_params = [{transform_indices = @transform_0, window_bounds = array<i64: 2, 32>}, {pipeline_mode = #tpu.pipeline_mode<synchronous>, transform_indices = @transform_1, window_bounds = array<i64: 1, 32>}, {pipeline_mode = #tpu.pipeline_mode<synchronous>, transform_indices = @transform_2, window_bounds = array<i64: 1, 32>}, {pipeline_mode = #tpu.pipeline_mode<synchronous>, transform_indices = @transform_3, window_bounds = array<i64: 32, 8>}, {pipeline_mode = #tpu.pipeline_mode<synchronous>, transform_indices = @transform_4, window_bounds = array<i64: 1, 8>}, {transform_indices = @transform_5, window_bounds = array<i64: 2, 8>}]} {
    %c0 = arith.constant 0 : index
    %c0_0 = arith.constant 0 : index
    %0 = vector.load %arg1[%c0, %c0_0] : memref<2x32xf32, #tpu.memory_space<vmem>>, vector<2x32xf32>
    %c0_1 = arith.constant 0 : index
    %c0_2 = arith.constant 0 : index
    %1 = vector.load %arg2[%c0_1, %c0_2] : memref<1x32xf32, #tpu.memory_space<vmem>>, vector<1x32xf32>
    %c0_3 = arith.constant 0 : index
    %c0_4 = arith.constant 0 : index
    %2 = vector.load %arg3[%c0_3, %c0_4] : memref<1x32xf32, #tpu.memory_space<vmem>>, vector<1x32xf32>
    %cst = arith.constant dense<0.000000e+00> : vector<2xf32>
    %3 = vector.multi_reduction <add>, %0, %cst [1] : vector<2x32xf32> to vector<2xf32>
    %4 = vector.shape_cast %3 : vector<2xf32> to vector<2x1xf32>
    %cst_5 = arith.constant 3.200000e+01 : f32
    %5 = vector.broadcast %cst_5 : f32 to vector<2x1xf32>
    %6 = arith.divf %4, %5 : vector<2x1xf32>
    %7 = vector.broadcast %6 : vector<2x1xf32> to vector<2x32xf32>
    %8 = arith.subf %0, %7 : vector<2x32xf32>
    %9 = arith.mulf %8, %8 : vector<2x32xf32>
    %cst_6 = arith.constant dense<0.000000e+00> : vector<2xf32>
    %10 = vector.multi_reduction <add>, %9, %cst_6 [1] : vector<2x32xf32> to vector<2xf32>
    %11 = vector.shape_cast %10 : vector<2xf32> to vector<2x1xf32>
    %cst_7 = arith.constant 3.200000e+01 : f32
    %12 = vector.broadcast %cst_7 : f32 to vector<2x1xf32>
    %13 = arith.divf %11, %12 : vector<2x1xf32>
    %14 = vector.broadcast %6 : vector<2x1xf32> to vector<2x32xf32>
    %15 = arith.subf %0, %14 : vector<2x32xf32>
    %cst_8 = arith.constant 9.99999997E-7 : f32
    %16 = vector.broadcast %cst_8 : f32 to vector<2x1xf32>
    %17 = arith.addf %13, %16 : vector<2x1xf32>
    %18 = math.rsqrt %17 : vector<2x1xf32>
    %19 = vector.broadcast %18 : vector<2x1xf32> to vector<2x32xf32>
    %20 = arith.mulf %15, %19 : vector<2x32xf32>
    %21 = vector.broadcast %1 : vector<1x32xf32> to vector<2x32xf32>
    %22 = arith.mulf %20, %21 : vector<2x32xf32>
    %23 = vector.broadcast %2 : vector<1x32xf32> to vector<2x32xf32>
    %24 = arith.addf %22, %23 : vector<2x32xf32>
    %25 = arith.truncf %24 : vector<2x32xf32> to vector<2x32xbf16>
    %c0_9 = arith.constant 0 : index
    %c0_10 = arith.constant 0 : index
    %26 = vector.load %arg4[%c0_9, %c0_10] : memref<32x8xbf16, #tpu.memory_space<vmem>>, vector<32x8xbf16>
    %cst_11 = arith.constant dense<0.000000e+00> : vector<2x8xf32>
    %27 = tpu.matmul %25, %26, %cst_11 {dimension_numbers = #tpu.dot_dimension_numbers<[1], [0], [0], [1], [0, 0, 1, 1], [], []>} : vector<2x32xbf16>, vector<32x8xbf16>, vector<2x8xf32> -> vector<2x8xf32>
    %c0_12 = arith.constant 0 : index
    %c0_13 = arith.constant 0 : index
    %28 = vector.load %arg5[%c0_12, %c0_13] : memref<1x8xf32, #tpu.memory_space<vmem>>, vector<1x8xf32>
    %29 = vector.broadcast %28 : vector<1x8xf32> to vector<2x8xf32>
    %30 = arith.addf %27, %29 : vector<2x8xf32>
    %c0_14 = arith.constant 0 : index
    %c0_15 = arith.constant 0 : index
    %31 = vector.load %arg6[%c0_14, %c0_15] : memref<2x8xf32, #tpu.memory_space<vmem>>, vector<2x8xf32>
    tpu.vector_store %arg6[%c0_14, %c0_15], %30 {strides = array<i32>} : memref<2x8xf32, #tpu.memory_space<vmem>>, vector<2x8xf32>,
    return
  }
  func.func @transform_0(%arg0: i32) -> (i32, i32) {
    %c0_i32 = arith.constant 0 : i32
    %c0_i32_0 = arith.constant 0 : i32
    return %arg0, %c0_i32 : i32, i32
  }
  func.func @transform_1(%arg0: i32) -> (i32, i32) {
    %c0_i32 = arith.constant 0 : i32
    %c0_i32_0 = arith.constant 0 : i32
    %c0_i32_1 = arith.constant 0 : i32
    return %c0_i32, %c0_i32_0 : i32, i32
  }
  func.func @transform_2(%arg0: i32) -> (i32, i32) {
    %c0_i32 = arith.constant 0 : i32
    %c0_i32_0 = arith.constant 0 : i32
    %c0_i32_1 = arith.constant 0 : i32
    return %c0_i32, %c0_i32_0 : i32, i32
  }
  func.func @transform_3(%arg0: i32) -> (i32, i32) {
    %c0_i32 = arith.constant 0 : i32
    %c0_i32_0 = arith.constant 0 : i32
    %c0_i32_1 = arith.constant 0 : i32
    return %c0_i32, %c0_i32_0 : i32, i32
  }
  func.func @transform_4(%arg0: i32) -> (i32, i32) {
    %c0_i32 = arith.constant 0 : i32
    %c0_i32_0 = arith.constant 0 : i32
    %c0_i32_1 = arith.constant 0 : i32
    return %c0_i32, %c0_i32_0 : i32, i32
  }
  func.func @transform_5(%arg0: i32) -> (i32, i32) {
    %c0_i32 = arith.constant 0 : i32
    %c0_i32_0 = arith.constant 0 : i32
    return %arg0, %c0_i32 : i32, i32
  }
}

</mosaic_0001>

<bundles_post_ra>
// kernel: vit_forward.10
= control target key start
LH: loop header
LB: loop body
LE: loop exit
PB: predicated region body
PF: predicated region fallthrough
CT: control target
= control target key end

     0   :  { %vm60_vm0 = vcmask 523264   ;;  %vm116_vm1 = vcmask 261120   ;;  %s213_s1 = inlined_call_operand.vmem [shape: bf16[64,32], index: 1, kind: input, shape index: {}]   ;;  %s214_s0 = inlined_call_operand.vmem [shape: f32[32,64], index: 0, kind: input, shape index: {}]   ;;  %s215_s2 = inlined_call_operand.vmem [shape: f32[1,32], index: 2, kind: input, shape index: {}]   ;;  %s216_s3 = inlined_call_operand.vmem [shape: f32[32,32], index: 3, kind: output, shape index: {}]  }
   0x1   :  { %v150_v0 = vld [vmem:[%s213_s1] sm:$0xff]   ;;  %v151_v1 = vld [vmem:[%s213_s1 + $0x8] sm:$0xff]   ;;  %v152_v2 = vld [vmem:[%s213_s1 + $0x10] sm:$0xff]  }
   0x2   :  { %138 = vmatprep.subr.bf16.mxu0 %v150_v0  ;;  %v15_v3 = vld [vmem:[%s214_s0] sm:$0xff]  ;;  %v16_v4 = vld [vmem:[%s214_s0 + $0x8] sm:$0xff]  ;;  %v153_v6 = vld [vmem:[%s213_s1 + $0x18] sm:$0xff]  }
   0x3   :  { %139 = vmatpush3.bf16.msra.mxu0 %v150_v0  ;;  %v19_v5 = vpack.c.bf16 %v16_v4, %v15_v3  ;;  %v17_v7 = vld [vmem:[%s214_s0 + $0x10] sm:$0xff]  ;;  %v18_v8 = vld [vmem:[%s214_s0 + $0x18] sm:$0xff]  ;;  %v125_v10 = vld [vmem:[%s215_s2] ss:$0 sm:$0xff] }
   0x4   :  { %140 = vmatprep.subr.bf16.mxu0 %v151_v1  ;;  %v20_v9 = vpack.c.bf16 %v18_v8, %v17_v7 }
   0x5   :  { %146 = vmatprep.mubr.msk.bf16.mxu0 %vm60_vm0, %v19_v5 }
   0x7   :  { %141 = vmatpush3.bf16.msra.mxu0 %v151_v1 }
   0x8   :  { %142 = vmatprep.subr.bf16.mxu0 %v152_v2 }
   0xb   :  { %143 = vmatpush3.bf16.msra.mxu0 %v152_v2 }
   0xc   :  { %144 = vmatprep.subr.bf16.mxu0 %v153_v6 }
   0xf   :  { %145 = vmatpush3.bf16.msra.mxu0 %v153_v6 }
  0x12   :  { %147 = vmatmul.mubr.msk.bf16.vlgmr.msra.gmra.mrb[0].mxu0 %vm60_vm0, %v20_v9 }
  0xe5   :  { %v148_v11 = vpop.f32.mrb[0].mxu0 }
  0xe6   :  { %v110_v12 = vadd.f32 %v148_v11, %v125_v10  ;;  %v101_v13 = vpop.f32.mrb[1].mxu0 }
  0xe7   :  { %v102_v14 = vadd.f32 %v125_v10, %v101_v13  ;;  %v149_v15 = vpop.f32.mrb[2].mxu0 }
  0xe8   :  { %119 = vst.msk [vmem:[%s216_s3 + $0x10] sm:$0xff] %vm116_vm1, %v110_v12  ;;  %v113_v16 = vadd.f32 %v149_v15, %v125_v10  ;;  %v104_v17 = vpop.f32.mrb[3].mxu0 }
  0xe9   :  { %117 = vst.msk [vmem:[%s216_s3] sm:$0xff] %vm116_vm1, %v102_v14  ;;  %v105_v18 = vadd.f32 %v125_v10, %v104_v17 }
  0xea   :  { %120 = vst.msk [vmem:[%s216_s3 + $0x18] sm:$0xff] %vm116_vm1, %v113_v16 }
  0xeb   :  { %118 = vst.msk [vmem:[%s216_s3 + $0x8] sm:$0xff] %vm116_vm1, %v105_v18 }

// kernel: vit_forward.11
= control target key start
LH: loop header
LB: loop body
LE: loop exit
PB: predicated region body
PF: predicated region fallthrough
CT: control target
= control target key end

     0   :  { %vm28_vm0 = vcmask 261120   ;;  %vm41_vm1 = vcmask 254976   ;;  %v267_v36 = vmov 0.0   ;;  %vm268_vm2 = vmmov 0   ;;  %s379_s0 = inlined_call_operand.vmem [shape: f32[34,32], index: 0, kind: input, shape index: {}]   ;;  %s380_s3 = inlined_call_operand.vmem [shape: bf16[32,96], index: 3, kind: input, shape index: {}]   ;;  %s381_s1 = inlined_call_operand.vmem [shape: f32[1,32], index: 1, kind: input, shape index: {}]   ;;  %s382_s2 = inlined_call_operand.vmem [shape: f32[1,32], index: 2, kind: input, shape index: {}]   ;;  %s383_s4 = inlined_call_operand.vmem [shape: f32[1,96], index: 4, kind: input, shape index: {}]   ;;  %s384_s5 = inlined_call_operand.vmem [shape: f32[34,96], index: 5, kind: output, shape index: {}]  }
   0x1   :  { %v23_v0 = vld [vmem:[%s379_s0 + $0x10] sm:$0xff]  ;;  %v24_v1 = vld [vmem:[%s379_s0 + $0x18] sm:$0xff]  ;;  %v21_v2 = vld [vmem:[%s379_s0] sm:$0xff]  ;;  %249 = vmatprep.subr.bf16.mxu1 %v267_v36  ;;  %233 = vmatprep.subr.bf16.mxu0 %v267_v36  ;;  %vm209_vm3 = vcmask 785408   ;;  %vm214_vm4 = vcmask 779264  }
   0x2   :  { %v35_v3 = vsel %vm28_vm0, %v23_v0, 0.0  ;;  %v29_v4 = vsel %vm28_vm0, %v21_v2, 0.0  ;;  %v22_v5 = vld [vmem:[%s379_s0 + $0x8] sm:$0xff]  ;;  %v38_v6 = vsel %vm28_vm0, %v24_v1, 0.0  ;;  %v25_v8 = vld [vmem:[%s379_s0 + $0x20] sm:$0x3]  ;;  %241 = vmatprep.mubr.msk.bf16.mxu1 %vm268_vm2, %v267_v36  ;;  %237 = vmatprep.mubr.msk.bf16.mxu0 %vm268_vm2, %v267_v36 }
   0x3   :  { %36 = vadd.xlane.f32.xlu0 %v35_v3  ;;  %30 = vadd.xlane.f32.xlu1 %v29_v4  ;;  %v32_v7 = vsel %vm28_vm0, %v22_v5, 0.0  ;;  %v42_v9 = vsel %vm41_vm1, %v25_v8, 0.0  ;;  %v255_v35 = vld [vmem:[%s380_s3] sm:$0xff]   ;;  %v256_v37 = vld [vmem:[%s380_s3 + $0x8] sm:$0xff]  }
   0x4   :  { %251 = vmatpush3.bf16.msra.mxu1 %v255_v35  ;;  %234 = vmatpush3.bf16.msra.mxu0 %v255_v35  ;;  %v220_v55 = vld [vmem:[%s381_s1] ss:$0 sm:$0xff] }
   0x5   :  { %250 = vmatprep.subr.bf16.mxu1 %v267_v36  ;;  %235 = vmatprep.subr.bf16.mxu0 %v267_v36  ;;  %v221_v61 = vld [vmem:[%s382_s2] ss:$0 sm:$0xff] }
   0x7   :  { %39 = vadd.xlane.f32.xlu0 %v38_v6  ;;  %33 = vadd.xlane.f32.xlu1 %v32_v7 }
   0x8   :  { %252 = vmatpush3.bf16.msra.mxu1 %v256_v37  ;;  %236 = vmatpush3.bf16.msra.mxu0 %v256_v37 }
   0xb   :  { %43 = vadd.xlane.f32.xlu0 %v42_v9 }
  0x90   :  { %v37_v10 = vpop.xlane.xlu0 %36  ;;  %v31_v11 = vpop.xlane.xlu1 %30 }
  0x91   :  { %v48_v12 = vmul.f32 0.03125, %v37_v10  ;;  %v46_v13 = vmul.f32 0.03125, %v31_v11 }
  0x93   :  { %v319_v14 = vsub.f32 %v23_v0, %v48_v12  ;;  %v321_v15 = vsub.f32 %v21_v2, %v46_v13 }
  0x94   :  { %v40_v16 = vpop.xlane.xlu0 %39  ;;  %v34_v17 = vpop.xlane.xlu1 %33 }
  0x95   :  { %v49_v18 = vmul.f32 0.03125, %v40_v16  ;;  %v58_v19 = vmul.f32 %v319_v14, %v319_v14  ;;  %v47_v20 = vmul.f32 0.03125, %v34_v17  ;;  %v56_v21 = vmul.f32 %v321_v15, %v321_v15 }
  0x97   :  { %v54_v22 = vsub.f32 %v24_v1, %v49_v18  ;;  %v67_v23 = vsel %vm28_vm0, %v58_v19, 0.0  ;;  %v328_v24 = vsub.f32 %v22_v5, %v47_v20  ;;  %v61_v28 = vsel %vm28_vm0, %v56_v21, 0.0 }
  0x98   :  { %v44_v25 = vpop.xlane.xlu0 %43  ;;  %68 = vadd.xlane.f32.xlu1 %v67_v23 }
  0x99   :  { %v50_v26 = vmul.f32 0.03125, %v44_v25  ;;  %v59_v27 = vmul.f32 %v54_v22, %v54_v22  ;;  %v57_v29 = vmul.f32 %v328_v24, %v328_v24 }
  0x9b   :  { %v55_v30 = vsub.f32 %v25_v8, %v50_v26  ;;  %v70_v31 = vsel %vm28_vm0, %v59_v27, 0.0  ;;  %v64_v33 = vsel %vm28_vm0, %v57_v29, 0.0 }
  0x9c   :  { %71 = vadd.xlane.f32.xlu0 %v70_v31  ;;  %62 = vadd.xlane.f32.xlu1 %v61_v28 }
  0x9d   :  { %v60_v32 = vmul.f32 %v55_v30, %v55_v30 }
  0x9f   :  { %v73_v34 = vsel %vm41_vm1, %v60_v32, 0.0 }
  0xa0   :  { %74 = vadd.xlane.f32.xlu1 %v73_v34  ;;  %65 = vadd.xlane.f32.xlu0 %v64_v33 }
 0x125   :  { %v69_v38 = vpop.xlane.xlu1 %68 }
 0x126   :  { %v78_v39 = vmul.f32 0.03125, %v69_v38 }
 0x128   :  { %v83_v40 = vadd.f32 1e-06, %v78_v39 }
 0x129   :  { %v72_v41 = vpop.xlane.xlu0 %71  ;;  %v63_v42 = vpop.xlane.xlu1 %62 }
 0x12a   :  { %257 = vrsqrt.f32 %v83_v40  ;;  %v79_v43 = vmul.f32 0.03125, %v72_v41  ;;  %v76_v44 = vmul.f32 0.03125, %v63_v42 }
 0x12c   :  { %v84_v45 = vadd.f32 1e-06, %v79_v43  ;;  %v81_v46 = vadd.f32 1e-06, %v76_v44 }
 0x12d   :  { %v66_v47 = vpop.xlane.xlu0 %65  ;;  %v75_v48 = vpop.xlane.xlu1 %74 }
 0x12e   :  { %259 = vrsqrt.f32 %v84_v45  ;;  %v77_v49 = vmul.f32 0.03125, %v66_v47  ;;  %v80_v50 = vmul.f32 0.03125, %v75_v48 }
 0x12f   :  { %261 = vrsqrt.f32 %v81_v46 }
 0x130   :  { %v82_v51 = vadd.f32 1e-06, %v77_v49  ;;  %v85_v52 = vadd.f32 1e-06, %v80_v50 }
 0x132   :  { %263 = vrsqrt.f32 %v82_v51 }
 0x133   :  { %265 = vrsqrt.f32 %v85_v52 }
 0x134   :  { %v258_v53 = vpop.eup %257 }
 0x135   :  { %v93_v54 = vmul.f32 %v258_v53, %v319_v14  ;;  %v222_v14 = vld [vmem:[%s383_s4] ss:$0 sm:$0xff] }
 0x137   :  { %v104_v59 = vmul.f32 %v220_v55, %v93_v54 }
 0x138   :  { %v260_v56 = vpop.eup %259 }
 0x139   :  { %v262_v57 = vpop.eup %261  ;;  %v94_v58 = vmul.f32 %v260_v56, %v54_v22  ;;  %v115_v2 = vadd.f32 %v221_v61, %v104_v59 }
 0x13a   :  { %v91_v60 = vmul.f32 %v262_v57, %v321_v15 }
 0x13b   :  { %v105_v62 = vmul.f32 %v220_v55, %v94_v58 }
 0x13c   :  { %v264_v63 = vpop.eup %263  ;;  %v102_v4 = vmul.f32 %v220_v55, %v91_v60 }
 0x13d   :  { %v266_v0 = vpop.eup %265  ;;  %v92_v1 = vmul.f32 %v264_v63, %v328_v24  ;;  %v116_v3 = vadd.f32 %v221_v61, %v105_v62 }
 0x13e   :  { %v95_v5 = vmul.f32 %v266_v0, %v55_v30  ;;  %v113_v9 = vadd.f32 %v221_v61, %v102_v4 }
 0x13f   :  { %v119_v6 = vpack.c.bf16 %v116_v3, %v115_v2  ;;  %v103_v7 = vmul.f32 %v220_v55, %v92_v1 }
 0x140   :  { %v106_v8 = vmul.f32 %v220_v55, %v95_v5 }
 0x141   :  { %242 = vmatmul.mubr.msk.bf16.vlgmr.msra.gmra.mrb[0].mxu1 %vm28_vm0, %v119_v6  ;;  %v114_v10 = vadd.f32 %v221_v61, %v103_v7 }
 0x142   :  { %245 = vmatprep.mubr.msk.bf16.mxu1 %vm268_vm2, %v267_v36  ;;  %v117_v12 = vadd.f32 %v221_v61, %v106_v8 }
 0x143   :  { %v118_v11 = vpack.c.bf16 %v114_v10, %v113_v9 }
 0x144   :  { %v120_v13 = vpack.c.bf16 %v117_v12, %v117_v12 }
 0x145   :  { %238 = vmatmul.mubr.msk.bf16.vlgmr.msra.gmra.mrb[0].mxu0 %vm28_vm0, %v118_v11 }
 0x149   :  { %246 = vmatmul.mubr.msk.bf16.gmra.mrb[4].mxu1 %vm28_vm0, %v120_v13 }
 0x214   :  { %v195_v15 = vpop.f32.mrb[0].mxu1 }
 0x215   :  { %v196_v16 = vadd.f32 %v222_v14, %v195_v15  ;;  %v243_v17 = vpop.f32.mrb[1].mxu1 }
 0x216   :  { %v198_v18 = vpop.f32.mrb[2].mxu1 }
 0x217   :  { %212 = vst.msk [vmem:[%s384_s5 + $0x10] sm:$0xff] %vm209_vm3, %v196_v16  ;;  %v199_v19 = vadd.f32 %v222_v14, %v198_v18  ;;  %v244_v20 = vpop.f32.mrb[3].mxu1 }
 0x218   :  { %v187_v21 = vpop.f32.mrb[0].mxu0 }
 0x219   :  { %213 = vst.msk [vmem:[%s384_s5 + $0x18] sm:$0xff] %vm209_vm3, %v199_v19  ;;  %v188_v22 = vadd.f32 %v222_v14, %v187_v21  ;;  %v239_v23 = vpop.f32.mrb[1].mxu0 }
 0x21a   :  { %v190_v24 = vpop.f32.mrb[2].mxu0 }
 0x21b   :  { %210 = vst.msk [vmem:[%s384_s5] sm:$0xff] %vm209_vm3, %v188_v22  ;;  %v191_v25 = vadd.f32 %v222_v14, %v190_v24  ;;  %v240_v26 = vpop.f32.mrb[3].mxu0 }
 0x21c   :  { %v203_v27 = vpop.f32.mrb[4].mxu1 }
 0x21d   :  { %211 = vst.msk [vmem:[%s384_s5 + $0x8] sm:$0xff] %vm209_vm3, %v191_v25  ;;  %v204_v28 = vadd.f32 %v222_v14, %v203_v27  ;;  %v247_v29 = vpop.f32.mrb[5].mxu1 }
 0x21e   :  { %v206_v30 = vpop.f32.mrb[6].mxu1 }
 0x21f   :  { %215 = vst.msk [vmem:[%s384_s5 + $0x20] sm:$0x3] %vm214_vm4, %v204_v28  ;;  %v248_v31 = vpop.f32.mrb[7].mxu1 }

// kernel: vit_forward.12
= control target key start
LH: loop header
LB: loop body
LE: loop exit
PB: predicated region body
PF: predicated region fallthrough
CT: control target
= control target key end

     0   :  { %s1135_s6 = smov 0   ;;  %s1284_s0 = inlined_call_operand.vmem [shape: f32[2,17,96], index: 0, kind: input, shape index: {}]   ;;  %s1285_s1 = inlined_call_operand.vmem [shape: f32[2,17,32], index: 1, kind: output, shape index: {}]  }
   0x1 LB: > { %s901_s7 = sadd.s32 4294967295, %s1108_s6   ;;  %p905_p0 = scmp.ge.s32.totalorder %s1108_s6, 1  ;;  %s1108_s6 = sphi %s1135_s6, %s11_s6  }
   0x2   : > { %p87_p1 = scmp.lt.s32.totalorder %s1108_s6, 3 }
   0x4   : > { %p88_p2 = pnand %p905_p0, %p87_p1 }
   0x5   : > { %p107_p3 = scmp.lt.s32.totalorder (!%p88_p2), %s901_s7, 1  ;;  %s1110_s12 = smov (!%p88_p2), 96   ;;  %vm134_vm0 = vcmask (!%p88_p2), 64512   ;;  %vm202_vm1 = vcmask (!%p88_p2), 131072   ;;  %vm195_vm2 = vcmask (!%p88_p2), 138240   ;;  %vm243_vm3 = vcmask (!%p88_p2), 1040384  }
   0x6   : > { %91 = sbr.rel (%p88_p2) target bundleno = 2684 (0xa7c), region = 24  ;;  %s1111_s13 = smov (!%p88_p2), 64   ;;  %v1114_v40 = vmov (!%p88_p2), 0   ;;  %vm833_vm4 = vcmask (!%p88_p2), 130048   ;;  %vm837_vm5 = vcmask (!%p88_p2), 195584   ;;  %vm841_vm6 = vcmask (!%p88_p2), 261120  }
   0x7   : > { %s1112_s14 = smov (!%p88_p2), 88   ;;  %s1113_s15 = smov (!%p88_p2), 120   ;;  %v1181_v41 = vsel (!%p88_p2), %vm243_vm3, 65535, %v1114_v40  ;;  %vm844_vm7 = vcmask (!%p88_p2), 253952  }
   0x8   : > { %s1115_s16 = smov (!%p88_p2), 56   ;;  %s1116_s17 = smov (!%p88_p2), 80  }
   0x9   : > { %s1117_s18 = smov (!%p88_p2), 112   ;;  %s1118_s19 = smov (!%p88_p2), 48  }
   0xa   : > { %s1119_s20 = smov (!%p88_p2), 72   ;;  %s1120_s21 = smov (!%p88_p2), 104  }
   0xb   : > { %s1121_s22 = smov (!%p88_p2), 40   ;;  %s1122_s23 = smov (!%p88_p2), 8  }
   0xc   : > { %s1123_s24 = smov (!%p88_p2), 16   ;;  %s1124_s25 = smov (!%p88_p2), 24  }
   0xd   : > { %s1287_s7 = smov (!%p107_p3, %s901_s7), 1 }
   0xe   : > { %s1030_s8 = smul.u32 24, %s1287_s7 }
  0x10   : > { %s111_s11 = scalar_lea.vmem %s1284_s0, %s1030_s8  ;;  %s116_s28 = scalar_lea.vmem %s1285_s1, %s1030_s8 }
  0x11   : > { %v118_v0 = vld [vmem:[%s111_s11] sm:$0xff]  ;;  %v119_v1 = vld [vmem:[%s111_s11 + $0x8] sm:$0xff]  ;;  %v120_v2 = vld [vmem:[%s111_s11 + $0x10] sm:$0x1] }
  0x12   : > { %v1151_v3 = vpack.c.bf16 %v119_v1, %v118_v0  ;;  %v121_v4 = vmul.f32 0.35355338, %v118_v0  ;;  %v122_v5 = vmul.f32 0.35355338, %v119_v1  ;;  %v1154_v6 = vpack.c.bf16 %v120_v2, %v120_v2 }
  0x13   : > { %v123_v12 = vmul.f32 0.35355338, %v120_v2 }
  0x14   : > { %130 = vrot.lane.b32.xlu0 %v1151_v3, %s1110_s12  ;;  %v1156_v7 = vpack.c.bf16 %v122_v5, %v121_v4 }
  0x15   : > { %v1165_v13 = vpack.c.bf16 %v123_v12, %v123_v12 }
  0x16   : > { %962 = vmatprep.mubr.msk.bf16.mxu0 %vm134_vm0, %v1156_v7 }
  0x18   : > { %132 = vrot.lane.b32.xlu0 %v1154_v6, %s1110_s12 }
  0x86   : > { %v131_v8 = vpop.permute.xlu0 %130 }
  0x87   : > { %1022 = vmatprep.subr.msk.bf16.mxu0 %vm134_vm0, %v131_v8  ;;  %v142_v9 = vsel %vm134_vm0, %v131_v8, 0 }
  0x88   : > { %959 = vmatpush3.bf16.xpose.msra.mxu0 %v142_v9 }
  0x8a   : > { %v133_v10 = vpop.permute.xlu0 %132 }
  0x8b   : > { %1023 = vmatprep.subr.msk.bf16.mxu0 %vm134_vm0, %v133_v10  ;;  %v145_v11 = vsel %vm134_vm0, %v133_v10, 0 }
  0x90   : > { %961 = vmatpush3.bf16.xpose.msra.mxu0 %v145_v11 }
  0x97   : > { %963 = vmatmul.mubr.msk.bf16.vlgmr.msra.gmra.mrb[0].mxu0 %vm134_vm0, %v1165_v13 }
 0x16a   : > { %v964_v14 = vpop.f32.mrb[0].mxu0 }
 0x16b   : > { %v181_v15 = vpop.f32.mrb[1].mxu0  ;;  %v203_v16 = vsel %vm202_vm1, %v964_v14, -inf }
 0x16c   : > { %204 = vmax.xlane.f32.xlu0 %v203_v16  ;;  %v965_v17 = vpop.f32.mrb[2].mxu0  ;;  %v196_v18 = vsel %vm195_vm2, %v181_v15, -inf }
 0x16d   : > { %197 = vmax.xlane.f32.xlu1 %v196_v18  ;;  %v184_v19 = vpop.f32.mrb[3].mxu0 }
 0x16e   : > { %v199_v20 = vsel %vm195_vm2, %v184_v19, -inf }
 0x171   : > { %200 = vmax.xlane.f32.xlu1 %v199_v20 }
 0x182   : > { %232 = vrot.lane.b32.xlu1 %v1151_v3, %s1111_s13  ;;  %303 = vrot.lane.b32.xlu0 %v1151_v3, %s1112_s14 }
 0x1f9   : > { %v205_v21 = vpop.xlane.xlu0 %204 }
 0x1fa   : > { %v208_v22 = vsub.f32 %v964_v14, %v205_v21  ;;  %v198_v23 = vpop.xlane.xlu1 %197 }
 0x1fb   : > { %v206_v24 = vsub.f32 %v181_v15, %v198_v23 }
 0x1fc   : > { %v213_v25 = vmul.f32 1.442695, %v208_v22 }
 0x1fd   : > { %v209_v26 = vmul.f32 1.442695, %v206_v24  ;;  %v304_v44 = vpop.permute.xlu0 %303 }
 0x1fe   : > { %1054 = vpow2.f32 %v213_v25  ;;  %v201_v27 = vpop.xlane.xlu1 %200  ;;  %v314_v53 = vsel %vm134_vm0, %v304_v44, 0 }
 0x1ff   : > { %v207_v28 = vsub.f32 %v184_v19, %v201_v27  ;;  %1056 = vpow2.f32 %v209_v26 }
 0x201   : > { %v211_v29 = vmul.f32 1.442695, %v207_v28 }
 0x202   : > { %v233_v30 = vpop.permute.xlu1 %232 }
 0x203   : > { %966 = vmatprep.subr.bf16.mxu1 %v233_v30  ;;  %1058 = vpow2.f32 %v211_v29 }
 0x204   : > { %967 = vmatpush3.bf16.msra.mxu1 %v233_v30 }
 0x208   : > { %v1055_v31 = vpop.eup %1054 }
 0x209   : > { %v221_v32 = vsel %vm202_vm1, %v1055_v31, 0.0  ;;  %v1057_v33 = vpop.eup %1056 }
 0x20a   : > { %222 = vadd.xlane.f32.xlu1 %v221_v32  ;;  %v215_v34 = vsel %vm195_vm2, %v1057_v33, 0.0 }
 0x20d   : > { %v1059_v35 = vpop.eup %1058 }
 0x20e   : > { %216 = vadd.xlane.f32.xlu1 %v215_v34  ;;  %v218_v36 = vsel %vm195_vm2, %v1059_v35, 0.0 }
 0x212   : > { %219 = vadd.xlane.f32.xlu1 %v218_v36 }
 0x223   : > { %234 = vrot.lane.b32.xlu1 %v1154_v6, %s1111_s13 }
 0x227   : > { %305 = vrot.lane.b32.xlu1 %v1154_v6, %s1112_s14 }
 0x22b   : > { %299 = vrot.lane.b32.xlu1 %v1156_v7, %s1113_s15 }
 0x22f   : > { %301 = vrot.lane.b32.xlu1 %v1165_v13, %s1113_s15 }
 0x297   : > { %v223_v37 = vpop.xlane.xlu1 %222 }
 0x298   : > { %1060 = vrcp.f32 %v223_v37 }
 0x29b   : > { %v217_v38 = vpop.xlane.xlu1 %216 }
 0x29c   : > { %1062 = vrcp.f32 %v217_v38 }
 0x29f   : > { %v220_v39 = vpop.xlane.xlu1 %219 }
 0x2a0   : > { %1064 = vrcp.f32 %v220_v39 }
 0x2a2   : > { %v1061_v45 = vpop.eup %1060 }
 0x2a3   : > { %v235_v42 = vpop.permute.xlu1 %234  ;;  %v229_v49 = vmul.f32 %v1061_v45, %v1055_v31 }
 0x2a4   : > { %v247_v43 = vand.u32 %v1181_v41, %v235_v42 }
 0x2a5   : > { %v231_v54 = vpack.c.bf16 %v229_v49, %v229_v49 }
 0x2a6   : > { %968 = vmatprep.subr.bf16.mxu1 %v247_v43  ;;  %v1063_v46 = vpop.eup %1062 }
 0x2a7   : > { %969 = vmatpush3.bf16.msra.mxu1 %v247_v43  ;;  %v306_v47 = vpop.permute.xlu1 %305  ;;  %v227_v50 = vmul.f32 %v1063_v46, %v1057_v33 }
 0x2a8   : > { %1024 = vmatprep.subr.msk.bf16.mxu1 %vm134_vm0, %v304_v44  ;;  %v317_v56 = vsel %vm134_vm0, %v306_v47, 0 }
 0x2aa   : > { %v1065_v48 = vpop.eup %1064 }
 0x2ab   : > { %v228_v51 = vmul.f32 %v1065_v48, %v1059_v35  ;;  %v300_v55 = vpop.permute.xlu1 %299 }
 0x2ad   : > { %v230_v52 = vpack.c.bf16 %v228_v51, %v227_v50 }
 0x2af   : > { %970 = vmatprep.mubr.msk.bf16.mxu1 %vm195_vm2, %v230_v52  ;;  %v302_v57 = vpop.permute.xlu1 %301 }
 0x2b0   : > { %971 = vmatmul.mubr.msk.bf16.vlgmr.msra.gmra.mrb[0].mxu1 %vm195_vm2, %v231_v54 }
 0x2b1   : > { %975 = vmatpush3.bf16.xpose.msra.mxu1 %v314_v53  ;;  %978 = vmatprep.mubr.msk.bf16.mxu1 %vm134_vm0, %v300_v55 }
 0x2b2   : > { %1025 = vmatprep.subr.msk.bf16.mxu1 %vm134_vm0, %v306_v47 }
 0x2b9   : > { %977 = vmatpush3.bf16.xpose.msra.mxu1 %v317_v56 }
 0x2c0   : > { %979 = vmatmul.mubr.msk.bf16.vlgmr.msra.gmra.mrb[4].mxu1 %vm134_vm0, %v302_v57 }
 0x383   : > { %v1192_v58 = vpop.f32.mrb[0].mxu1 }
 0x384   : > { %v1194_v59 = vpop.f32.mrb[1].mxu1 }
 0x385   : > { %v973_v60 = vpop.f32.mrb[2].mxu1 }
 0x386   : > { %v1196_v61 = vpop.f32.mrb[3].mxu1 }
 0x393   : > { %v980_v62 = vpop.f32.mrb[4].mxu1 }
 0x394   : > { %v353_v63 = vpop.f32.mrb[5].mxu1  ;;  %v373_v5 = vsel %vm202_vm1, %v980_v62, -inf }
 0x395   : > { %v981_v0 = vpop.f32.mrb[6].mxu1  ;;  %v367_v1 = vsel %vm195_vm2, %v353_v63, -inf }
 0x396   : > { %368 = vmax.xlane.f32.xlu1 %v367_v1  ;;  %v356_v2 = vpop.f32.mrb[7].mxu1 }
 0x397   : > { %v370_v4 = vsel %vm195_vm2, %v356_v2, -inf }
 0x398   : > { %371 = vmax.xlane.f32.xlu0 %v370_v4 }
 0x39a   : > { %374 = vmax.xlane.f32.xlu1 %v373_v5 }
 0x3ab   : > { %402 = vrot.lane.b32.xlu1 %v1151_v3, %s1115_s16 }
 0x423   : > { %v369_v8 = vpop.xlane.xlu1 %368 }
 0x424   : > { %v376_v10 = vsub.f32 %v353_v63, %v369_v8 }
 0x425   : > { %v372_v9 = vpop.xlane.xlu0 %371 }
 0x426   : > { %v377_v11 = vsub.f32 %v356_v2, %v372_v9  ;;  %v379_v16 = vmul.f32 1.442695, %v376_v10 }
 0x427   : > { %v375_v12 = vpop.xlane.xlu1 %374 }
 0x428   : > { %v381_v14 = vmul.f32 1.442695, %v377_v11  ;;  %v378_v15 = vsub.f32 %v980_v62, %v375_v12 }
 0x42a   : > { %1066 = vpow2.f32 %v381_v14  ;;  %v383_v17 = vmul.f32 1.442695, %v378_v15 }
 0x42b   : > { %v403_v18 = vpop.permute.xlu1 %402 }
 0x42c   : > { %1068 = vpow2.f32 %v383_v17  ;;  %982 = vmatprep.subr.bf16.mxu0 %v403_v18 }
 0x42d   : > { %983 = vmatpush3.bf16.msra.mxu0 %v403_v18  ;;  %1070 = vpow2.f32 %v379_v16 }
 0x434   : > { %v1067_v19 = vpop.eup %1066 }
 0x435   : > { %v388_v20 = vsel %vm195_vm2, %v1067_v19, 0.0 }
 0x436   : > { %v1069_v21 = vpop.eup %1068  ;;  %389 = vadd.xlane.f32.xlu1 %v388_v20 }
 0x437   : > { %v391_v22 = vsel %vm202_vm1, %v1069_v21, 0.0  ;;  %v1071_v23 = vpop.eup %1070 }
 0x438   : > { %392 = vadd.xlane.f32.xlu0 %v391_v22  ;;  %v385_v24 = vsel %vm195_vm2, %v1071_v23, 0.0 }
 0x43c   : > { %386 = vadd.xlane.f32.xlu0 %v385_v24 }
 0x447   : > { %468 = vrot.lane.b32.xlu1 %v1151_v3, %s1116_s17 }
 0x44b   : > { %470 = vrot.lane.b32.xlu1 %v1154_v6, %s1116_s17 }
 0x44f   : > { %466 = vrot.lane.b32.xlu1 %v1165_v13, %s1117_s18 }
 0x452   : > { %404 = vrot.lane.b32.xlu0 %v1154_v6, %s1115_s16 }
 0x456   : > { %464 = vrot.lane.b32.xlu0 %v1156_v7, %s1117_s18 }
 0x4c3   : > { %v390_v25 = vpop.xlane.xlu1 %389 }
 0x4c5   : > { %v393_v26 = vpop.xlane.xlu0 %392 }
 0x4c6   : > { %1072 = vrcp.f32 %v393_v26 }
 0x4c7   : > { %1074 = vrcp.f32 %v390_v25  ;;  %v469_v30 = vpop.permute.xlu1 %468 }
 0x4c8   : > { %v479_v38 = vsel %vm134_vm0, %v469_v30, 0 }
 0x4c9   : > { %v387_v27 = vpop.xlane.xlu0 %386 }
 0x4ca   : > { %1076 = vrcp.f32 %v387_v27 }
 0x4cb   : > { %v471_v42 = vpop.permute.xlu1 %470 }
 0x4cc   : > { %v482_v43 = vsel %vm134_vm0, %v471_v42, 0 }
 0x4cd   : > { %v405_v28 = vpop.permute.xlu0 %404 }
 0x4ce   : > { %v414_v29 = vand.u32 %v405_v28, %v1181_v41 }
 0x4cf   : > { %v467_v44 = vpop.permute.xlu1 %466 }
 0x4d0   : > { %984 = vmatprep.subr.bf16.mxu0 %v414_v29  ;;  %v1073_v31 = vpop.eup %1072 }
 0x4d1   : > { %985 = vmatpush3.bf16.msra.mxu0 %v414_v29  ;;  %v1075_v32 = vpop.eup %1074  ;;  %v399_v34 = vmul.f32 %v1073_v31, %v1069_v21  ;;  %v465_v40 = vpop.permute.xlu0 %464 }
 0x4d2   : > { %1026 = vmatprep.subr.msk.bf16.mxu0 %vm134_vm0, %v469_v30  ;;  %v398_v36 = vmul.f32 %v1075_v32, %v1067_v19 }
 0x4d3   : > { %v401_v39 = vpack.c.bf16 %v399_v34, %v399_v34 }
 0x4d4   : > { %v1077_v33 = vpop.eup %1076 }
 0x4d5   : > { %v397_v35 = vmul.f32 %v1077_v33, %v1071_v23 }
 0x4d7   : > { %v400_v37 = vpack.c.bf16 %v398_v36, %v397_v35 }
 0x4d9   : > { %986 = vmatprep.mubr.msk.bf16.mxu0 %vm195_vm2, %v400_v37 }
 0x4da   : > { %987 = vmatmul.mubr.msk.bf16.vlgmr.msra.gmra.mrb[4].mxu0 %vm195_vm2, %v401_v39 }
 0x4db   : > { %991 = vmatpush3.bf16.xpose.msra.mxu0 %v479_v38  ;;  %994 = vmatprep.mubr.msk.bf16.mxu0 %vm134_vm0, %v465_v40 }
 0x4dc   : > { %1027 = vmatprep.subr.msk.bf16.mxu0 %vm134_vm0, %v471_v42 }
 0x4e3   : > { %993 = vmatpush3.bf16.xpose.msra.mxu0 %v482_v43 }
 0x4ea   : > { %995 = vmatmul.mubr.msk.bf16.vlgmr.msra.gmra.mrb[8].mxu0 %vm134_vm0, %v467_v44 }
 0x5ad   : > { %v1221_v45 = vpop.f32.mrb[4].mxu0 }
 0x5ae   : > { %v1223_v46 = vpop.f32.mrb[5].mxu0 }
 0x5af   : > { %v989_v47 = vpop.f32.mrb[6].mxu0 }
 0x5b0   : > { %v1225_v48 = vpop.f32.mrb[7].mxu0 }
 0x5bd   : > { %v996_v49 = vpop.f32.mrb[8].mxu0 }
 0x5be   : > { %v518_v50 = vpop.f32.mrb[9].mxu0  ;;  %v538_v55 = vsel %vm202_vm1, %v996_v49, -inf }
 0x5bf   : > { %v997_v51 = vpop.f32.mrb[10].mxu0  ;;  %v532_v52 = vsel %vm195_vm2, %v518_v50, -inf }
 0x5c0   : > { %533 = vmax.xlane.f32.xlu0 %v532_v52  ;;  %v521_v53 = vpop.f32.mrb[11].mxu0 }
 0x5c1   : > { %v535_v54 = vsel %vm195_vm2, %v521_v53, -inf }
 0x5c2   : > { %536 = vmax.xlane.f32.xlu1 %v535_v54 }
 0x5c4   : > { %539 = vmax.xlane.f32.xlu0 %v538_v55 }
 0x5d3   : > { %567 = vrot.lane.b32.xlu1 %v1151_v3, %s1118_s19 }
 0x64d   : > { %v534_v56 = vpop.xlane.xlu0 %533 }
 0x64e   : > { %v541_v60 = vsub.f32 %v518_v50, %v534_v56 }
 0x64f   : > { %v537_v57 = vpop.xlane.xlu1 %536 }
 0x650   : > { %v542_v62 = vsub.f32 %v521_v53, %v537_v57  ;;  %v544_v4 = vmul.f32 1.442695, %v541_v60 }
 0x651   : > { %v540_v63 = vpop.xlane.xlu0 %539 }
 0x652   : > { %v546_v0 = vmul.f32 1.442695, %v542_v62  ;;  %v543_v1 = vsub.f32 %v996_v49, %v540_v63 }
 0x653   : > { %v568_v2 = vpop.permute.xlu1 %567 }
 0x654   : > { %1078 = vpow2.f32 %v546_v0  ;;  %v548_v5 = vmul.f32 1.442695, %v543_v1  ;;  %998 = vmatprep.subr.bf16.mxu1 %v568_v2 }
 0x655   : > { %999 = vmatpush3.bf16.msra.mxu1 %v568_v2 }
 0x656   : > { %1080 = vpow2.f32 %v548_v5 }
 0x657   : > { %1082 = vpow2.f32 %v544_v4 }
 0x65e   : > { %v1079_v8 = vpop.eup %1078 }
 0x65f   : > { %v553_v9 = vsel %vm195_vm2, %v1079_v8, 0.0 }
 0x660   : > { %v1081_v10 = vpop.eup %1080  ;;  %554 = vadd.xlane.f32.xlu1 %v553_v9 }
 0x661   : > { %v556_v11 = vsel %vm202_vm1, %v1081_v10, 0.0  ;;  %v1083_v12 = vpop.eup %1082 }
 0x662   : > { %557 = vadd.xlane.f32.xlu0 %v556_v11  ;;  %v550_v14 = vsel %vm195_vm2, %v1083_v12, 0.0 }
 0x666   : > { %551 = vadd.xlane.f32.xlu0 %v550_v14 }
 0x671   : > { %633 = vrot.lane.b32.xlu1 %v1151_v3, %s1119_s20 }
 0x675   : > { %635 = vrot.lane.b32.xlu1 %v1154_v6, %s1119_s20 }
 0x679   : > { %631 = vrot.lane.b32.xlu1 %v1165_v13, %s1120_s21 }
 0x67c   : > { %569 = vrot.lane.b32.xlu0 %v1154_v6, %s1118_s19 }
 0x680   : > { %629 = vrot.lane.b32.xlu0 %v1156_v7, %s1120_s21 }
 0x6ed   : > { %v555_v15 = vpop.xlane.xlu1 %554 }
 0x6ef   : > { %v558_v16 = vpop.xlane.xlu0 %557 }
 0x6f0   : > { %1084 = vrcp.f32 %v558_v16 }
 0x6f1   : > { %1086 = vrcp.f32 %v555_v15  ;;  %v634_v20 = vpop.permute.xlu1 %633 }
 0x6f2   : > { %v644_v26 = vsel %vm134_vm0, %v634_v20, 0 }
 0x6f3   : > { %v552_v17 = vpop.xlane.xlu0 %551 }
 0x6f4   : > { %1088 = vrcp.f32 %v552_v17 }
 0x6f5   : > { %v636_v29 = vpop.permute.xlu1 %635 }
 0x6f6   : > { %v647_v30 = vsel %vm134_vm0, %v636_v29, 0 }
 0x6f7   : > { %v570_v18 = vpop.permute.xlu0 %569 }
 0x6f8   : > { %v579_v19 = vand.u32 %v570_v18, %v1181_v41 }
 0x6f9   : > { %v632_v31 = vpop.permute.xlu1 %631 }
 0x6fa   : > { %1000 = vmatprep.subr.bf16.mxu1 %v579_v19  ;;  %v1085_v21 = vpop.eup %1084 }
 0x6fb   : > { %1001 = vmatpush3.bf16.msra.mxu1 %v579_v19  ;;  %v1087_v22 = vpop.eup %1086  ;;  %v564_v23 = vmul.f32 %v1085_v21, %v1081_v10  ;;  %v630_v28 = vpop.permute.xlu0 %629 }
 0x6fc   : > { %1028 = vmatprep.subr.msk.bf16.mxu1 %vm134_vm0, %v634_v20  ;;  %v563_v7 = vmul.f32 %v1087_v22, %v1079_v8 }
 0x6fd   : > { %v566_v27 = vpack.c.bf16 %v564_v23, %v564_v23 }
 0x6fe   : > { %v1089_v13 = vpop.eup %1088 }
 0x6ff   : > { %v562_v24 = vmul.f32 %v1089_v13, %v1083_v12 }
 0x701   : > { %v565_v25 = vpack.c.bf16 %v563_v7, %v562_v24 }
 0x703   : > { %1002 = vmatprep.mubr.msk.bf16.mxu1 %vm195_vm2, %v565_v25 }
 0x704   : > { %1003 = vmatmul.mubr.msk.bf16.vlgmr.msra.gmra.mrb[8].mxu1 %vm195_vm2, %v566_v27 }
 0x705   : > { %1007 = vmatpush3.bf16.xpose.msra.mxu1 %v644_v26  ;;  %1010 = vmatprep.mubr.msk.bf16.mxu1 %vm134_vm0, %v630_v28 }
 0x706   : > { %1029 = vmatprep.subr.msk.bf16.mxu1 %vm134_vm0, %v636_v29 }
 0x70d   : > { %1009 = vmatpush3.bf16.xpose.msra.mxu1 %v647_v30 }
 0x714   : > { %1011 = vmatmul.mubr.msk.bf16.vlgmr.msra.gmra.mrb[12].mxu1 %vm134_vm0, %v632_v31 }
 0x7d7   : > { %v1004_v32 = vpop.f32.mrb[8].mxu1 }
 0x7d8   : > { %v615_v33 = vpop.f32.mrb[9].mxu1 }
 0x7d9   : > { %v1005_v34 = vpop.f32.mrb[10].mxu1 }
 0x7da   : > { %v618_v35 = vpop.f32.mrb[11].mxu1 }
 0x7e7   : > { %v1012_v36 = vpop.f32.mrb[12].mxu1 }
 0x7e8   : > { %v683_v37 = vpop.f32.mrb[13].mxu1  ;;  %v703_v43 = vsel %vm202_vm1, %v1012_v36, -inf }
 0x7e9   : > { %v1013_v38 = vpop.f32.mrb[14].mxu1  ;;  %v697_v39 = vsel %vm195_vm2, %v683_v37, -inf }
 0x7ea   : > { %698 = vmax.xlane.f32.xlu0 %v697_v39  ;;  %v686_v40 = vpop.f32.mrb[15].mxu1 }
 0x7eb   : > { %v700_v42 = vsel %vm195_vm2, %v686_v40, -inf }
 0x7ec   : > { %701 = vmax.xlane.f32.xlu1 %v700_v42 }
 0x7ee   : > { %704 = vmax.xlane.f32.xlu0 %v703_v43 }
 0x877   : > { %v699_v44 = vpop.xlane.xlu0 %698 }
 0x878   : > { %v706_v49 = vsub.f32 %v683_v37, %v699_v44 }
 0x879   : > { %v702_v47 = vpop.xlane.xlu1 %701 }
 0x87a   : > { %v707_v50 = vsub.f32 %v686_v40, %v702_v47  ;;  %v709_v54 = vmul.f32 1.442695, %v706_v49 }
 0x87b   : > { %v705_v51 = vpop.xlane.xlu0 %704 }
 0x87c   : > { %v711_v52 = vmul.f32 1.442695, %v707_v50  ;;  %v708_v53 = vsub.f32 %v1012_v36, %v705_v51 }
 0x87e   : > { %1090 = vpow2.f32 %v711_v52  ;;  %v713_v55 = vmul.f32 1.442695, %v708_v53 }
 0x880   : > { %1092 = vpow2.f32 %v713_v55 }
 0x881   : > { %1094 = vpow2.f32 %v709_v54 }
 0x888   : > { %v1091_v56 = vpop.eup %1090 }
 0x889   : > { %v718_v57 = vsel %vm195_vm2, %v1091_v56, 0.0 }
 0x88a   : > { %v1093_v60 = vpop.eup %1092  ;;  %719 = vadd.xlane.f32.xlu1 %v718_v57 }
 0x88b   : > { %v721_v62 = vsel %vm202_vm1, %v1093_v60, 0.0  ;;  %v1095_v63 = vpop.eup %1094 }
 0x88c   : > { %722 = vadd.xlane.f32.xlu0 %v721_v62  ;;  %v715_v0 = vsel %vm195_vm2, %v1095_v63, 0.0 }
 0x890   : > { %716 = vadd.xlane.f32.xlu0 %v715_v0 }
 0x89b   : > { %732 = vrot.lane.b32.xlu1 %v1151_v3, %s1121_s22 }
 0x89f   : > { %797 = vrot.lane.b32.xlu1 %v1223_v46, %s1122_s23 }
 0x8a3   : > { %799 = vrot.lane.b32.xlu1 %v1225_v48, %s1122_s23 }
 0x8a6   : > { %734 = vrot.lane.b32.xlu0 %v1154_v6, %s1121_s22 }
 0x8a7   : > { %809 = vrot.lane.b32.xlu1 %v615_v33, %s1123_s24 }
 0x8aa   : > { %801 = vrot.lane.b32.xlu0 %v1221_v45, %s1122_s23 }
 0x8ab   : > { %813 = vrot.lane.b32.xlu1 %v1004_v32, %s1123_s24 }
 0x8ae   : > { %811 = vrot.lane.b32.xlu0 %v618_v35, %s1123_s24 }
 0x917   : > { %v720_v1 = vpop.xlane.xlu1 %719 }
 0x919   : > { %v723_v2 = vpop.xlane.xlu0 %722 }
 0x91a   : > { %1096 = vrcp.f32 %v723_v2 }
 0x91b   : > { %v733_v4 = vpop.permute.xlu1 %732  ;;  %1098 = vrcp.f32 %v720_v1 }
 0x91c   : > { %1014 = vmatprep.subr.bf16.mxu0 %v733_v4 }
 0x91d   : > { %v717_v3 = vpop.xlane.xlu0 %716  ;;  %1015 = vmatpush3.bf16.msra.mxu0 %v733_v4 }
 0x91e   : > { %1100 = vrcp.f32 %v717_v3 }
 0x91f   : > { %v798_v17 = vpop.permute.xlu1 %797 }
 0x920   : > { %v830_v13 = vsel %vm134_vm0, %v1194_v59, %v798_v17 }
 0x921   : > { %v735_v46 = vpop.permute.xlu0 %734 }
 0x922   : > { %v744_v48 = vand.u32 %v735_v46, %v1181_v41 }
 0x923   : > { %v800_v18 = vpop.permute.xlu1 %799 }
 0x924   : > { %1016 = vmatprep.subr.bf16.mxu0 %v744_v48  ;;  %v1097_v6 = vpop.eup %1096  ;;  %v831_v7 = vsel %vm134_vm0, %v1196_v61, %v800_v18 }
 0x925   : > { %1017 = vmatpush3.bf16.msra.mxu0 %v744_v48  ;;  %v1099_v5 = vpop.eup %1098  ;;  %v729_v45 = vmul.f32 %v1097_v6, %v1093_v60  ;;  %v802_v19 = vpop.permute.xlu0 %801 }
 0x926   : > { %v728_v10 = vmul.f32 %v1099_v5, %v1091_v56  ;;  %v832_v59 = vsel %vm134_vm0, %v1192_v58, %v802_v19 }
 0x927   : > { %v731_v12 = vpack.c.bf16 %v729_v45, %v729_v45  ;;  %v810_v20 = vpop.permute.xlu1 %809 }
 0x928   : > { %v1101_v8 = vpop.eup %1100  ;;  %v834_v23 = vsel %vm833_vm4, %v830_v13, %v810_v20 }
 0x929   : > { %v727_v9 = vmul.f32 %v1101_v8, %v1095_v63  ;;  %v812_v21 = vpop.permute.xlu0 %811 }
 0x92a   : > { %v835_v26 = vsel %vm833_vm4, %v831_v7, %v812_v21 }
 0x92b   : > { %v730_v11 = vpack.c.bf16 %v728_v10, %v727_v9  ;;  %v814_v22 = vpop.permute.xlu1 %813 }
 0x92c   : > { %v836_v29 = vsel %vm833_vm4, %v832_v59, %v814_v22 }
 0x92d   : > { %1018 = vmatprep.mubr.msk.bf16.mxu0 %vm195_vm2, %v730_v11 }
 0x92e   : > { %1019 = vmatmul.mubr.msk.bf16.vlgmr.msra.gmra.mrb[12].mxu0 %vm195_vm2, %v731_v12 }
 0xa01   : > { %v1020_v14 = vpop.f32.mrb[12].mxu0 }
 0xa02   : > { %v780_v15 = vpop.f32.mrb[13].mxu0 }
 0xa03   : > { %821 = vrot.lane.b32.xlu0 %v780_v15, %s1124_s25  ;;  %v1021_v41 = vpop.f32.mrb[14].mxu0 }
 0xa04   : > { %v783_v16 = vpop.f32.mrb[15].mxu0 }
 0xa05   : > { %823 = vrot.lane.b32.xlu1 %v783_v16, %s1124_s25 }
 0xa07   : > { %825 = vrot.lane.b32.xlu0 %v1020_v14, %s1124_s25 }
 0xa75   : > { %v822_v24 = vpop.permute.xlu0 %821 }
 0xa76   : > { %v838_v25 = vsel %vm837_vm5, %v834_v23, %v822_v24 }
 0xa77   : > { %842 = vst.msk [vmem:[%s116_s28] sm:$0xff] %vm841_vm6, %v838_v25  ;;  %v824_v27 = vpop.permute.xlu1 %823 }
 0xa78   : > { %v839_v28 = vsel %vm837_vm5, %v835_v26, %v824_v27 }
 0xa79   : > { %843 = vst.msk [vmem:[%s116_s28 + $0x8] sm:$0xff] %vm841_vm6, %v839_v28  ;;  %v826_v30 = vpop.permute.xlu0 %825 }
 0xa7a   : > { %v840_v31 = vsel %vm837_vm5, %v836_v29, %v826_v30 }
 0xa7b   : > { %845 = vst.msk [vmem:[%s116_s28 + $0x10] sm:$0x1] %vm844_vm7, %v840_v31 }
 0xa7c PF: > { %s11_s6 = sadd.s32 1, %s1108_s6  }
 0xa7d   : > { %p8_p4 = scmp.ge.s32.totalorder %s11_s6, 4  }
 0xa7f   :  { %10 = sbr.rel (!%p8_p4) target bundleno = 1 (0x1), region = 54 }

// kernel: vit_forward.13
= control target key start
LH: loop header
LB: loop body
LE: loop exit
PB: predicated region body
PF: predicated region fallthrough
CT: control target
= control target key end

     0   :  { %v175_v0 = vmov 0.0   ;;  %vm176_vm0 = vmmov 0   ;;  %vm42_vm1 = vcmask 261120   ;;  %vm134_vm2 = vcmask 254976   ;;  %s266_s1 = inlined_call_operand.vmem [shape: bf16[32,32], index: 1, kind: input, shape index: {}]   ;;  %s267_s0 = inlined_call_operand.vmem [shape: f32[34,32], index: 0, kind: input, shape index: {}]   ;;  %s268_s3 = inlined_call_operand.vmem [shape: f32[34,32], index: 3, kind: input, shape index: {}]   ;;  %s269_s2 = inlined_call_operand.vmem [shape: f32[1,32], index: 2, kind: input, shape index: {}]   ;;  %s270_s4 = inlined_call_operand.vmem [shape: f32[34,32], index: 4, kind: output, shape index: {}]  }
   0x1   :  { %167 = vmatprep.subr.bf16.mxu1 %v175_v0  ;;  %v173_v1 = vld [vmem:[%s266_s1] sm:$0xff]   ;;  %151 = vmatprep.subr.bf16.mxu0 %v175_v0  ;;  %v174_v2 = vld [vmem:[%s266_s1 + $0x8] sm:$0xff]   ;;  %v20_v3 = vld [vmem:[%s267_s0 + $0x10] sm:$0xff] }
   0x2   :  { %159 = vmatprep.mubr.msk.bf16.mxu1 %vm176_vm0, %v175_v0  ;;  %155 = vmatprep.mubr.msk.bf16.mxu0 %vm176_vm0, %v175_v0  ;;  %v21_v4 = vld [vmem:[%s267_s0 + $0x18] sm:$0xff]  ;;  %v18_v5 = vld [vmem:[%s267_s0] sm:$0xff]  ;;  %v19_v6 = vld [vmem:[%s267_s0 + $0x8] sm:$0xff] }
   0x3   :  { %169 = vmatpush3.bf16.msra.mxu1 %v173_v1  ;;  %152 = vmatpush3.bf16.msra.mxu0 %v173_v1  ;;  %v24_v7 = vpack.c.bf16 %v21_v4, %v20_v3  ;;  %v23_v8 = vpack.c.bf16 %v19_v6, %v18_v5  ;;  %v22_v9 = vld [vmem:[%s267_s0 + $0x20] sm:$0x3]  ;;  %v110_v11 = vld [vmem:[%s268_s3 + $0x10] sm:$0xff]  ;;  %v111_v15 = vld [vmem:[%s268_s3 + $0x18] sm:$0xff] }
   0x4   :  { %168 = vmatprep.subr.bf16.mxu1 %v175_v0  ;;  %153 = vmatprep.subr.bf16.mxu0 %v175_v0  ;;  %v25_v10 = vpack.c.bf16 %v22_v9, %v22_v9  ;;  %v108_v12 = vld [vmem:[%s268_s3] sm:$0xff]  ;;  %v109_v17 = vld [vmem:[%s268_s3 + $0x8] sm:$0xff] }
   0x5   :  { %v145_v14 = vld [vmem:[%s269_s2] ss:$0 sm:$0xff] }
   0x6   :  { %v112_v32 = vld [vmem:[%s268_s3 + $0x20] sm:$0x3] }
   0x7   :  { %170 = vmatpush3.bf16.msra.mxu1 %v174_v2  ;;  %154 = vmatpush3.bf16.msra.mxu0 %v174_v2 }
   0xa   :  { %160 = vmatmul.mubr.msk.bf16.vlgmr.msra.gmra.mrb[0].mxu1 %vm42_vm1, %v24_v7  ;;  %156 = vmatmul.mubr.msk.bf16.vlgmr.msra.gmra.mrb[0].mxu0 %vm42_vm1, %v23_v8 }
   0xb   :  { %163 = vmatprep.mubr.msk.bf16.mxu1 %vm176_vm0, %v175_v0 }
  0x12   :  { %164 = vmatmul.mubr.msk.bf16.gmra.mrb[4].mxu1 %vm42_vm1, %v25_v10 }
  0xdd   :  { %v94_v13 = vpop.f32.mrb[0].mxu1  ;;  %v86_v16 = vpop.f32.mrb[0].mxu0 }
  0xde   :  { %v115_v18 = vadd.f32 %v110_v11, %v94_v13  ;;  %v161_v19 = vpop.f32.mrb[1].mxu1  ;;  %v113_v20 = vadd.f32 %v108_v12, %v86_v16  ;;  %v157_v21 = vpop.f32.mrb[1].mxu0 }
  0xdf   :  { %v97_v22 = vpop.f32.mrb[2].mxu1  ;;  %v89_v23 = vpop.f32.mrb[2].mxu0 }
  0xe0   :  { %v127_v24 = vadd.f32 %v145_v14, %v115_v18  ;;  %v116_v25 = vadd.f32 %v111_v15, %v97_v22  ;;  %v125_v26 = vadd.f32 %v145_v14, %v113_v20  ;;  %v162_v27 = vpop.f32.mrb[3].mxu1  ;;  %v114_v28 = vadd.f32 %v109_v17, %v89_v23  ;;  %v158_v29 = vpop.f32.mrb[3].mxu0 }
  0xe2   :  { %132 = vst.msk [vmem:[%s270_s4 + $0x10] sm:$0xff] %vm42_vm1, %v127_v24  ;;  %v128_v30 = vadd.f32 %v145_v14, %v116_v25  ;;  %130 = vst.msk [vmem:[%s270_s4] sm:$0xff] %vm42_vm1, %v125_v26  ;;  %v126_v31 = vadd.f32 %v145_v14, %v114_v28 }
  0xe4   :  { %133 = vst.msk [vmem:[%s270_s4 + $0x18] sm:$0xff] %vm42_vm1, %v128_v30  ;;  %131 = vst.msk [vmem:[%s270_s4 + $0x8] sm:$0xff] %vm42_vm1, %v126_v31 }
  0xe5   :  { %v102_v33 = vpop.f32.mrb[4].mxu1 }
  0xe6   :  { %v117_v34 = vadd.f32 %v112_v32, %v102_v33  ;;  %v165_v35 = vpop.f32.mrb[5].mxu1 }
  0xe7   :  { %v105_v36 = vpop.f32.mrb[6].mxu1 }
  0xe8   :  { %v129_v37 = vadd.f32 %v145_v14, %v117_v34  ;;  %v166_v38 = vpop.f32.mrb[7].mxu1 }
  0xea   :  { %135 = vst.msk [vmem:[%s270_s4 + $0x20] sm:$0x3] %vm134_vm2, %v129_v37 }

// kernel: vit_forward.19
= control target key start
LH: loop header
LB: loop body
LE: loop exit
PB: predicated region body
PF: predicated region fallthrough
CT: control target
= control target key end

     0   :  { %vm25_vm0 = vcmask 254976   ;;  %s249_s0 = inlined_call_operand.vmem [shape: f32[2,32], index: 0, kind: input, shape index: {}]   ;;  %s250_s1 = inlined_call_operand.vmem [shape: f32[1,32], index: 1, kind: input, shape index: {}]   ;;  %s251_s2 = inlined_call_operand.vmem [shape: f32[1,32], index: 2, kind: input, shape index: {}]   ;;  %s252_s3 = inlined_call_operand.vmem [shape: bf16[32,8], index: 3, kind: input, shape index: {}]   ;;  %s253_s4 = inlined_call_operand.vmem [shape: f32[1,8], index: 4, kind: input, shape index: {}]   ;;  %s254_s5 = inlined_call_operand.hbm [shape: f32[2,8], index: 5, kind: output, shape index: {}]  }
   0x1   :  { %v22_v0 = vld [vmem:[%s249_s0] sm:$0x3] }
   0x2   :  { %v26_v1 = vsel %vm25_vm0, %v22_v0, 0.0 }
   0x3   :  { %27 = vadd.xlane.f32.xlu0 %v26_v1 }
   0x4   :  { %10 = vsyncpa [#allocation3], 0  ;;  %v158_v7 = vld [vmem:[%s252_s3] sm:$0xff]   ;;  %v186_v8 = vmov 0.0   ;;  %v159_v9 = vld [vmem:[%s252_s3 + $0x8] sm:$0xff]   ;;  %vm187_vm1 = vmmov 0  }
   0x5   :  { %147 = vmatprep.subr.bf16.mxu0 %v186_v8  ;;  %151 = vmatprep.mubr.msk.bf16.mxu0 %vm187_vm1, %v186_v8  ;;  %v138_v14 = vld [vmem:[%s250_s1] ss:$0 sm:$0xff]  ;;  %vm78_vm2 = vcmask 261120   ;;  %s188_s28 = smov [#allocation2]   ;;  %vm122_vm3 = vcmask 58368  }
   0x6   :  { %148 = vmatpush3.bf16.msra.mxu0 %v158_v7  ;;  %v139_v16 = vld [vmem:[%s251_s2] ss:$0 sm:$0xff]  ;;  %s130_s29 = sshll.u32 %s188_s28, 4  ;;  %s131_s29 = int_to_ptr.vmem [resolvable:$true] %s130_s29 }
   0x7   :  { %149 = vmatprep.subr.bf16.mxu0 %v186_v8  ;;  %v140_v20 = vld [vmem:[%s253_s4] ss:$0 sm:$0xff]  ;;  %s162_s1 = scalar_lea.vmem %s131_s29, 32  ;;  %p167_p1 = scmp.lt.s32.totalorder %s131_s29, %s131_s29 }
   0x8   :  { %p163_p0 = scmp.ne.s32.totalorder %s131_s29, %s162_s1  ;;  %p168_p2 = scmp.lt.s32.totalorder %s162_s1, %s162_s1 }
   0xa   :  { %150 = vmatpush3.bf16.msra.mxu0 %v159_v9  ;;  %p169_p3 = por %p168_p2, %p167_p1 }
   0xc   :  { %p170_p4 = pnand %p169_p3, %p163_p0 }
  0x90   :  { %v28_v2 = vpop.xlane.xlu0 %27 }
  0x91   :  { %v30_v3 = vmul.f32 0.03125, %v28_v2 }
  0x93   :  { %v31_v4 = vsub.f32 %v22_v0, %v30_v3 }
  0x95   :  { %v32_v5 = vmul.f32 %v31_v4, %v31_v4 }
  0x97   :  { %v33_v6 = vsel %vm25_vm0, %v32_v5, 0.0 }
  0x98   :  { %34 = vadd.xlane.f32.xlu0 %v33_v6 }
 0x125   :  { %v35_v10 = vpop.xlane.xlu0 %34 }
 0x126   :  { %v36_v11 = vmul.f32 0.03125, %v35_v10 }
 0x128   :  { %v37_v12 = vadd.f32 1e-06, %v36_v11 }
 0x12a   :  { %160 = vrsqrt.f32 %v37_v12 }
 0x134   :  { %v161_v13 = vpop.eup %160 }
 0x135   :  { %v39_v15 = vmul.f32 %v161_v13, %v31_v4 }
 0x137   :  { %v46_v17 = vmul.f32 %v138_v14, %v39_v15 }
 0x139   :  { %v53_v18 = vadd.f32 %v139_v16, %v46_v17 }
 0x13b   :  { %v54_v19 = vpack.c.bf16 %v53_v18, %v53_v18 }
 0x13d   :  { %152 = vmatmul.mubr.msk.bf16.vlgmr.msra.gmra.mrb[0].mxu0 %vm78_vm2, %v54_v19 }
 0x210   :  { %v116_v21 = vpop.f32.mrb[0].mxu0 }
 0x211   :  { %v117_v22 = vadd.f32 %v140_v20, %v116_v21  ;;  %v153_v23 = vpop.f32.mrb[1].mxu0 }
 0x212   :  { %v119_v24 = vpop.f32.mrb[2].mxu0 }
 0x213   :  { %v154_v25 = vpop.f32.mrb[3].mxu0  ;;  %123 = vst.msk [vmem:[#allocation2] sm:$0x3] %vm122_vm3, %v117_v22 }
 0x214   :  { %173 = shalt.err (!%p170_p4)
}
 0x215   :  { %s174_s4 = scalar_lea.hbm %s254_s5, 32 }
 0x216   :  { %p175_p5 = scmp.ne.s32.totalorder %s254_s5, %s174_s4  ;;  %p178_p6 = scmp.lt.u32.totalorder %s174_s4, %s254_s5 }
 0x218   :  { %p180_p7 = pnand %p178_p6, %p175_p5 }
 0x21a   :  { %183 = shalt.err (!%p180_p7)
}
 0x21b   :  { %133 = dma.vmem_to_hbm [thread:$0]  %s131_s29, 32, %s254_s5, [#allocation3]  }
 0x21c   :  { %184 = dma.done.wait [#allocation3], 32  }
 0x21d   :  { %185 = vsyncadd [#allocation3], 4294967264 }
 0x21e   :  { %137 = vsyncpa [#allocation3], 1 }

// kernel: vit_forward.14
= control target key start
LH: loop header
LB: loop body
LE: loop exit
PB: predicated region body
PF: predicated region fallthrough
CT: control target
= control target key end

     0   :  { %vm34_vm0 = vcmask 261120   ;;  %vm47_vm1 = vcmask 254976   ;;  %v629_v36 = vmov 0.0   ;;  %vm630_vm2 = vmmov 0   ;;  %s871_s0 = inlined_call_operand.vmem [shape: f32[34,32], index: 0, kind: input, shape index: {}]   ;;  %s872_s3 = inlined_call_operand.vmem [shape: bf16[32,128], index: 3, kind: input, shape index: {}]   ;;  %s873_s1 = inlined_call_operand.vmem [shape: f32[1,32], index: 1, kind: input, shape index: {}]   ;;  %s874_s2 = inlined_call_operand.vmem [shape: f32[1,32], index: 2, kind: input, shape index: {}]   ;;  %s875_s5 = inlined_call_operand.vmem [shape: bf16[128,32], index: 5, kind: input, shape index: {}]   ;;  %s876_s4 = inlined_call_operand.vmem [shape: f32[1,128], index: 4, kind: input, shape index: {}]   ;;  %s877_s6 = inlined_call_operand.vmem [shape: f32[1,32], index: 6, kind: input, shape index: {}]   ;;  %s878_s7 = inlined_call_operand.vmem [shape: f32[34,32], index: 7, kind: output, shape index: {}]  }
   0x1   :  { %v674_v0 = vld [vmem:[%s871_s0] sm:$0xff]  ;;  %v679_v1 = vld [vmem:[%s871_s0 + $0x10] sm:$0xff]  ;;  %v684_v2 = vld [vmem:[%s871_s0 + $0x8] sm:$0xff]  ;;  %527 = vmatprep.subr.bf16.mxu0 %v629_v36  ;;  %571 = vmatprep.subr.bf16.mxu1 %v629_v36 }
   0x2   :  { %v35_v3 = vsel %vm34_vm0, %v674_v0, 0.0  ;;  %v41_v4 = vsel %vm34_vm0, %v679_v1, 0.0  ;;  %v693_v5 = vld [vmem:[%s871_s0 + $0x18] sm:$0xff]  ;;  %v38_v6 = vsel %vm34_vm0, %v684_v2, 0.0  ;;  %v702_v8 = vld [vmem:[%s871_s0 + $0x20] sm:$0x3]  ;;  %531 = vmatprep.mubr.msk.bf16.mxu0 %vm630_vm2, %v629_v36  ;;  %563 = vmatprep.mubr.msk.bf16.mxu1 %vm630_vm2, %v629_v36 }
   0x3   :  { %36 = vadd.xlane.f32.xlu0 %v35_v3  ;;  %42 = vadd.xlane.f32.xlu1 %v41_v4  ;;  %v44_v7 = vsel %vm34_vm0, %v693_v5, 0.0  ;;  %v48_v9 = vsel %vm47_vm1, %v702_v8, 0.0  ;;  %v589_v35 = vld [vmem:[%s872_s3] sm:$0xff]   ;;  %v590_v37 = vld [vmem:[%s872_s3 + $0x8] sm:$0xff]  }
   0x4   :  { %528 = vmatpush3.bf16.msra.mxu0 %v589_v35  ;;  %v494_v55 = vld [vmem:[%s873_s1] ss:$0 sm:$0xff] }
   0x5   :  { %529 = vmatprep.subr.bf16.mxu0 %v629_v36  ;;  %v495_v60 = vld [vmem:[%s874_s2] ss:$0 sm:$0xff] }
   0x7   :  { %39 = vadd.xlane.f32.xlu0 %v38_v6  ;;  %45 = vadd.xlane.f32.xlu1 %v44_v7 }
   0x8   :  { %530 = vmatpush3.bf16.msra.mxu0 %v590_v37 }
   0x9   :  { %543 = vmatprep.subr.bf16.mxu0 %v629_v36 }
   0xb   :  { %49 = vadd.xlane.f32.xlu0 %v48_v9 }
  0x90   :  { %v37_v10 = vpop.xlane.xlu0 %36  ;;  %v43_v11 = vpop.xlane.xlu1 %42 }
  0x91   :  { %v52_v12 = vmul.f32 0.03125, %v37_v10  ;;  %v54_v13 = vmul.f32 0.03125, %v43_v11 }
  0x93   :  { %v57_v14 = vsub.f32 %v674_v0, %v52_v12  ;;  %v708_v15 = vsub.f32 %v679_v1, %v54_v13 }
  0x94   :  { %v40_v16 = vpop.xlane.xlu0 %39  ;;  %v46_v17 = vpop.xlane.xlu1 %45 }
  0x95   :  { %v53_v18 = vmul.f32 0.03125, %v40_v16  ;;  %v55_v19 = vmul.f32 0.03125, %v46_v17  ;;  %v62_v20 = vmul.f32 %v57_v14, %v57_v14  ;;  %v64_v21 = vmul.f32 %v708_v15, %v708_v15 }
  0x97   :  { %v58_v22 = vsub.f32 %v684_v2, %v53_v18  ;;  %v714_v23 = vsub.f32 %v693_v5, %v55_v19  ;;  %v67_v24 = vsel %vm34_vm0, %v62_v20, 0.0  ;;  %v73_v27 = vsel %vm34_vm0, %v64_v21, 0.0  ;;  %v591_v19 = vld [vmem:[%s875_s5] sm:$0xff]   ;;  %v592_v20 = vld [vmem:[%s875_s5 + $0x8] sm:$0xff]   ;;  %v593_v21 = vld [vmem:[%s875_s5 + $0x10] sm:$0xff]  }
  0x98   :  { %68 = vadd.xlane.f32.xlu1 %v67_v24  ;;  %v50_v25 = vpop.xlane.xlu0 %49  ;;  %579 = vmatpush3.bf16.msra.mxu1 %v591_v19  ;;  %v596_v24 = vld [vmem:[%s875_s5 + $0x28] sm:$0xff]  }
  0x99   :  { %v56_v26 = vmul.f32 0.03125, %v50_v25  ;;  %v63_v28 = vmul.f32 %v58_v22, %v58_v22  ;;  %v65_v29 = vmul.f32 %v714_v23, %v714_v23  ;;  %572 = vmatprep.subr.bf16.mxu1 %v629_v36  ;;  %v597_v25 = vld [vmem:[%s875_s5 + $0x30] sm:$0xff]  }
  0x9b   :  { %v721_v30 = vsub.f32 %v702_v8, %v56_v26  ;;  %v70_v31 = vsel %vm34_vm0, %v63_v28, 0.0  ;;  %v76_v32 = vsel %vm34_vm0, %v65_v29, 0.0  ;;  %v598_v26 = vld [vmem:[%s875_s5 + $0x38] sm:$0xff]  }
  0x9c   :  { %74 = vadd.xlane.f32.xlu1 %v73_v27  ;;  %71 = vadd.xlane.f32.xlu0 %v70_v31  ;;  %v496_v27 = vld [vmem:[%s876_s4] ss:$0 sm:$0xff] }
  0x9d   :  { %v66_v33 = vmul.f32 %v721_v30, %v721_v30  ;;  %580 = vmatpush3.bf16.msra.mxu1 %v592_v20 }
  0x9e   :  { %573 = vmatprep.subr.bf16.mxu1 %v629_v36 }
  0x9f   :  { %v79_v34 = vsel %vm47_vm1, %v66_v33, 0.0 }
  0xa0   :  { %77 = vadd.xlane.f32.xlu0 %v76_v32  ;;  %80 = vadd.xlane.f32.xlu1 %v79_v34 }
  0xa1   :  { %581 = vmatpush3.bf16.msra.mxu1 %v593_v21 }
  0xa2   :  { %574 = vmatprep.subr.bf16.mxu1 %v629_v36 }
 0x125   :  { %v69_v38 = vpop.xlane.xlu1 %68 }
 0x126   :  { %v82_v39 = vmul.f32 0.03125, %v69_v38 }
 0x128   :  { %v87_v40 = vadd.f32 1e-06, %v82_v39 }
 0x129   :  { %v75_v41 = vpop.xlane.xlu1 %74  ;;  %v72_v42 = vpop.xlane.xlu0 %71 }
 0x12a   :  { %599 = vrsqrt.f32 %v87_v40  ;;  %v84_v43 = vmul.f32 0.03125, %v75_v41  ;;  %v83_v44 = vmul.f32 0.03125, %v72_v42 }
 0x12c   :  { %v88_v45 = vadd.f32 1e-06, %v83_v44  ;;  %v89_v46 = vadd.f32 1e-06, %v84_v43 }
 0x12d   :  { %v81_v47 = vpop.xlane.xlu1 %80  ;;  %v78_v48 = vpop.xlane.xlu0 %77 }
 0x12e   :  { %v85_v49 = vmul.f32 0.03125, %v78_v48  ;;  %601 = vrsqrt.f32 %v88_v45  ;;  %v86_v50 = vmul.f32 0.03125, %v81_v47 }
 0x12f   :  { %603 = vrsqrt.f32 %v89_v46 }
 0x130   :  { %v90_v51 = vadd.f32 1e-06, %v85_v49  ;;  %v91_v52 = vadd.f32 1e-06, %v86_v50 }
 0x132   :  { %605 = vrsqrt.f32 %v90_v51 }
 0x133   :  { %607 = vrsqrt.f32 %v91_v52 }
 0x134   :  { %v600_v53 = vpop.eup %599 }
 0x135   :  { %v97_v54 = vmul.f32 %v600_v53, %v57_v14 }
 0x137   :  { %v108_v58 = vmul.f32 %v494_v55, %v97_v54 }
 0x138   :  { %v602_v56 = vpop.eup %601 }
 0x139   :  { %v98_v57 = vmul.f32 %v602_v56, %v58_v22  ;;  %v604_v59 = vpop.eup %603  ;;  %v119_v4 = vadd.f32 %v495_v60, %v108_v58  ;;  %v594_v22 = vld [vmem:[%s875_s5 + $0x18] sm:$0xff]  }
 0x13a   :  { %v99_v63 = vmul.f32 %v604_v59, %v708_v15  ;;  %582 = vmatpush3.bf16.msra.mxu1 %v594_v22 }
 0x13b   :  { %v109_v61 = vmul.f32 %v494_v55, %v98_v57  ;;  %575 = vmatprep.subr.bf16.mxu1 %v629_v36 }
 0x13c   :  { %v606_v62 = vpop.eup %605  ;;  %v110_v11 = vmul.f32 %v494_v55, %v99_v63 }
 0x13d   :  { %v100_v3 = vmul.f32 %v606_v62, %v714_v23  ;;  %v120_v6 = vadd.f32 %v495_v60, %v109_v61  ;;  %v608_v10 = vpop.eup %607  ;;  %v595_v23 = vld [vmem:[%s875_s5 + $0x20] sm:$0xff]  }
 0x13e   :  { %v101_v12 = vmul.f32 %v608_v10, %v721_v30  ;;  %v121_v14 = vadd.f32 %v495_v60, %v110_v11  ;;  %583 = vmatpush3.bf16.msra.mxu1 %v595_v23 }
 0x13f   :  { %v124_v7 = vpack.c.bf16 %v120_v6, %v119_v4  ;;  %v111_v9 = vmul.f32 %v494_v55, %v100_v3  ;;  %576 = vmatprep.subr.bf16.mxu1 %v629_v36 }
 0x140   :  { %v112_v17 = vmul.f32 %v494_v55, %v101_v12 }
 0x141   :  { %532 = vmatmul.mubr.msk.bf16.vlgmr.msra.gmra.mrb[0].mxu0 %vm34_vm0, %v124_v7  ;;  %v122_v13 = vadd.f32 %v495_v60, %v111_v9 }
 0x142   :  { %535 = vmatprep.mubr.msk.bf16.mxu0 %vm630_vm2, %v629_v36  ;;  %v123_v15 = vadd.f32 %v495_v60, %v112_v17  ;;  %544 = vmatpush3.bf16.msra.mxu0 %v591_v19 }
 0x143   :  { %v125_v16 = vpack.c.bf16 %v122_v13, %v121_v14  ;;  %545 = vmatprep.subr.bf16.mxu0 %v629_v36  ;;  %584 = vmatpush3.bf16.msra.mxu1 %v596_v24 }
 0x144   :  { %v126_v18 = vpack.c.bf16 %v123_v15, %v123_v15  ;;  %577 = vmatprep.subr.bf16.mxu1 %v629_v36 }
 0x146   :  { %546 = vmatpush3.bf16.msra.mxu0 %v592_v20 }
 0x147   :  { %547 = vmatprep.subr.bf16.mxu0 %v629_v36  ;;  %585 = vmatpush3.bf16.msra.mxu1 %v597_v25 }
 0x148   :  { %578 = vmatprep.subr.bf16.mxu1 %v629_v36 }
 0x149   :  { %536 = vmatmul.mubr.msk.bf16.gmra.mrb[4].mxu0 %vm34_vm0, %v125_v16 }
 0x14a   :  { %539 = vmatprep.mubr.msk.bf16.mxu0 %vm630_vm2, %v629_v36  ;;  %548 = vmatpush3.bf16.msra.mxu0 %v593_v21 }
 0x14b   :  { %549 = vmatprep.subr.bf16.mxu0 %v629_v36  ;;  %586 = vmatpush3.bf16.msra.mxu1 %v598_v26 }
 0x14e   :  { %550 = vmatpush3.bf16.msra.mxu0 %v594_v22 }
 0x14f   :  { %551 = vmatprep.subr.bf16.mxu0 %v629_v36 }
 0x151   :  { %540 = vmatmul.mubr.msk.bf16.gmra.mrb[8].mxu0 %vm34_vm0, %v126_v18 }
 0x152   :  { %559 = vmatprep.mubr.msk.bf16.mxu0 %vm630_vm2, %v629_v36  ;;  %552 = vmatpush3.bf16.msra.mxu0 %v595_v23 }
 0x153   :  { %553 = vmatprep.subr.bf16.mxu0 %v629_v36 }
 0x156   :  { %554 = vmatpush3.bf16.msra.mxu0 %v596_v24 }
 0x157   :  { %555 = vmatprep.subr.bf16.mxu0 %v629_v36 }
 0x15a   :  { %556 = vmatpush3.bf16.msra.mxu0 %v597_v25 }
 0x15b   :  { %557 = vmatprep.subr.bf16.mxu0 %v629_v36 }
 0x15e   :  { %558 = vmatpush3.bf16.msra.mxu0 %v598_v26 }
 0x214   :  { %v193_v28 = vpop.f32.mrb[0].mxu0 }
 0x215   :  { %v801_v29 = vadd.f32 %v496_v27, %v193_v28  ;;  %v533_v30 = vpop.f32.mrb[1].mxu0 }
 0x216   :  { %v196_v31 = vpop.f32.mrb[2].mxu0 }
 0x217   :  { %v804_v32 = vmul.f32 0.70710677, %v801_v29  ;;  %v806_v33 = vadd.f32 %v496_v27, %v196_v31  ;;  %v534_v34 = vpop.f32.mrb[3].mxu0 }
 0x219   :  { %v225_v35 = vand.u32 2147483647, %v804_v32  ;;  %v810_v37 = vmul.f32 0.70710677, %v806_v33  ;;  %vm325_vm3 = vcmp.ge.f32.partialorder %v804_v32, 0.0  ;;  %v216_v32 = vmul.f32 0.5, %v806_v33 }
 0x21b   :  { %v230_v38 = vmul.f32 0.3275911, %v225_v35  ;;  %v226_v39 = vand.u32 2147483647, %v810_v37  ;;  %v295_v54 = vsub.f32 0.0, %v225_v35  ;;  %vm326_vm4 = vcmp.ge.f32.partialorder %v810_v37, 0.0 }
 0x21c   :  { %v201_v40 = vpop.f32.mrb[4].mxu0 }
 0x21d   :  { %v235_v41 = vadd.f32 1.0, %v230_v38  ;;  %v231_v42 = vmul.f32 0.3275911, %v226_v39  ;;  %v537_v43 = vpop.f32.mrb[5].mxu0  ;;  %v813_v44 = vadd.f32 %v496_v27, %v201_v40  ;;  %v296_v62 = vsub.f32 0.0, %v226_v39 }
 0x21e   :  { %v204_v45 = vpop.f32.mrb[6].mxu0  ;;  %v300_v4 = vmul.f32 %v295_v54, %v225_v35 }
 0x21f   :  { %609 = vrcp.f32 %v235_v41  ;;  %v236_v46 = vadd.f32 1.0, %v231_v42  ;;  %v538_v47 = vpop.f32.mrb[7].mxu0  ;;  %v816_v48 = vmul.f32 0.70710677, %v813_v44  ;;  %v818_v49 = vadd.f32 %v496_v27, %v204_v45 }
 0x220   :  { %v301_v13 = vmul.f32 %v296_v62, %v226_v39  ;;  %v305_v14 = vmul.f32 1.442695, %v300_v4 }
 0x221   :  { %611 = vrcp.f32 %v236_v46  ;;  %v227_v50 = vand.u32 2147483647, %v816_v48  ;;  %v822_v51 = vmul.f32 0.70710677, %v818_v49  ;;  %vm327_vm5 = vcmp.ge.f32.partialorder %v816_v48, 0.0 }
 0x222   :  { %v307_v21 = vmul.f32 1.442695, %v301_v13 }
 0x223   :  { %v232_v52 = vmul.f32 0.3275911, %v227_v50  ;;  %v228_v55 = vand.u32 2147483647, %v822_v51  ;;  %v297_v18 = vsub.f32 0.0, %v227_v50  ;;  %vm328_vm6 = vcmp.ge.f32.partialorder %v822_v51, 0.0 }
 0x224   :  { %v209_v53 = vpop.f32.mrb[8].mxu0 }
 0x225   :  { %v825_v56 = vadd.f32 %v496_v27, %v209_v53  ;;  %v541_v57 = vpop.f32.mrb[9].mxu0  ;;  %v237_v58 = vadd.f32 1.0, %v232_v52  ;;  %v233_v60 = vmul.f32 0.3275911, %v228_v55  ;;  %v298_v23 = vsub.f32 0.0, %v228_v55 }
 0x226   :  { %v212_v59 = vpop.f32.mrb[10].mxu0  ;;  %v302_v26 = vmul.f32 %v297_v18, %v227_v50 }
 0x227   :  { %v828_v61 = vmul.f32 0.70710677, %v825_v56  ;;  %613 = vrcp.f32 %v237_v58  ;;  %v542_v63 = vpop.f32.mrb[11].mxu0  ;;  %v238_v6 = vadd.f32 1.0, %v233_v60  ;;  %v303_v38 = vmul.f32 %v298_v23, %v228_v55 }
 0x228   :  { %v309_v41 = vmul.f32 1.442695, %v302_v26 }
 0x229   :  { %v610_v3 = vpop.eup %609  ;;  %v229_v7 = vand.u32 2147483647, %v828_v61  ;;  %615 = vrcp.f32 %v238_v6  ;;  %v311_v50 = vmul.f32 1.442695, %v303_v38  ;;  %v215_v38 = vmul.f32 0.5, %v801_v29 }
 0x22a   :  { %v250_v9 = vmul.f32 1.0614054, %v610_v3  ;;  %vm329_vm7 = vcmp.ge.f32.partialorder %v828_v61, 0.0 }
 0x22b   :  { %v234_v10 = vmul.f32 0.3275911, %v229_v7  ;;  %v612_v11 = vpop.eup %611  ;;  %v299_v39 = vsub.f32 0.0, %v229_v7 }
 0x22c   :  { %v255_v12 = vadd.f32 -1.4531521, %v250_v9  ;;  %v251_v16 = vmul.f32 1.0614054, %v612_v11 }
 0x22d   :  { %v239_v17 = vadd.f32 1.0, %v234_v10  ;;  %v304_v57 = vmul.f32 %v299_v39, %v229_v7 }
 0x22e   :  { %v260_v15 = vmul.f32 %v610_v3, %v255_v12  ;;  %v256_v19 = vadd.f32 -1.4531521, %v251_v16 }
 0x22f   :  { %617 = vrcp.f32 %v239_v17  ;;  %v313_v13 = vmul.f32 1.442695, %v304_v57 }
 0x230   :  { %v265_v20 = vadd.f32 1.4214138, %v260_v15  ;;  %619 = vpow2.f32 %v305_v14  ;;  %v261_v22 = vmul.f32 %v612_v11, %v256_v19 }
 0x231   :  { %v614_v24 = vpop.eup %613  ;;  %621 = vpow2.f32 %v307_v21 }
 0x232   :  { %v270_v25 = vmul.f32 %v610_v3, %v265_v20  ;;  %v266_v27 = vadd.f32 1.4214138, %v261_v22  ;;  %v252_v28 = vmul.f32 1.0614054, %v614_v24  ;;  %623 = vpow2.f32 %v309_v41 }
 0x233   :  { %v616_v31 = vpop.eup %615  ;;  %625 = vpow2.f32 %v311_v50 }
 0x234   :  { %v275_v30 = vadd.f32 -0.28449672, %v270_v25  ;;  %v271_v34 = vmul.f32 %v612_v11, %v266_v27  ;;  %v257_v35 = vadd.f32 -1.4531521, %v252_v28  ;;  %v253_v42 = vmul.f32 1.0614054, %v616_v31 }
 0x235   :  { %627 = vpow2.f32 %v313_v13 }
 0x236   :  { %v280_v40 = vmul.f32 %v610_v3, %v275_v30  ;;  %v276_v43 = vadd.f32 -0.28449672, %v271_v34  ;;  %v262_v45 = vmul.f32 %v614_v24, %v257_v35  ;;  %v258_v47 = vadd.f32 -1.4531521, %v253_v42 }
 0x238   :  { %v285_v46 = vadd.f32 0.2548296, %v280_v40  ;;  %v281_v53 = vmul.f32 %v612_v11, %v276_v43  ;;  %v267_v54 = vadd.f32 1.4214138, %v262_v45  ;;  %v263_v59 = vmul.f32 %v616_v31, %v258_v47 }
 0x239   :  { %v618_v52 = vpop.eup %617 }
 0x23a   :  { %v290_v58 = vmul.f32 %v610_v3, %v285_v46  ;;  %v254_v60 = vmul.f32 1.0614054, %v618_v52  ;;  %v620_v62 = vpop.eup %619  ;;  %v286_v63 = vadd.f32 0.2548296, %v281_v53  ;;  %v272_v55 = vmul.f32 %v614_v24, %v267_v54 }
 0x23b   :  { %v268_v6 = vadd.f32 1.4214138, %v263_v59  ;;  %v622_v14 = vpop.eup %621 }
 0x23c   :  { %v315_v4 = vmul.f32 %v620_v62, %v290_v58  ;;  %v259_v9 = vadd.f32 -1.4531521, %v254_v60  ;;  %v291_v10 = vmul.f32 %v612_v11, %v286_v63  ;;  %v277_v12 = vadd.f32 -0.28449672, %v272_v55  ;;  %v624_v28 = vpop.eup %623 }
 0x23d   :  { %v273_v17 = vmul.f32 %v616_v31, %v268_v6  ;;  %v626_v45 = vpop.eup %625  ;;  %v217_v55 = vmul.f32 0.5, %v813_v44  ;;  %v502_v44 = vld [vmem:[%s877_s6] ss:$0 sm:$0xff] }
 0x23e   :  { %v320_v16 = vsub.f32 1.0, %v315_v4  ;;  %v264_v15 = vmul.f32 %v618_v52, %v259_v9  ;;  %v316_v18 = vmul.f32 %v622_v14, %v291_v10  ;;  %v282_v7 = vmul.f32 %v614_v24, %v277_v12 }
 0x23f   :  { %v278_v19 = vadd.f32 -0.28449672, %v273_v17  ;;  %v628_v29 = vpop.eup %627  ;;  %v218_v4 = vmul.f32 0.5, %v818_v49  ;;  %v219_v14 = vmul.f32 0.5, %v825_v56 }
 0x240   :  { %v330_v3 = vsub.f32 0.0, %v320_v16  ;;  %v269_v20 = vadd.f32 1.4214138, %v264_v15  ;;  %v321_v21 = vsub.f32 1.0, %v316_v18  ;;  %v287_v22 = vadd.f32 0.2548296, %v282_v7 }
 0x241   :  { %v283_v25 = vmul.f32 %v616_v31, %v278_v19 }
 0x242   :  { %v335_v23 = vsel %vm325_vm3, %v320_v16, %v330_v3  ;;  %v274_v11 = vmul.f32 %v618_v52, %v269_v20  ;;  %v331_v26 = vsub.f32 0.0, %v321_v21  ;;  %v292_v27 = vmul.f32 %v614_v24, %v287_v22 }
 0x243   :  { %v340_v30 = vadd.f32 1.0, %v335_v23  ;;  %v288_v34 = vadd.f32 0.2548296, %v283_v25 }
 0x244   :  { %v279_v35 = vadd.f32 -0.28449672, %v274_v11  ;;  %v336_v39 = vsel %vm326_vm4, %v321_v21, %v331_v26  ;;  %v317_v40 = vmul.f32 %v624_v28, %v292_v27 }
 0x245   :  { %v341_v41 = vadd.f32 1.0, %v336_v39  ;;  %v293_v42 = vmul.f32 %v616_v31, %v288_v34  ;;  %v345_v47 = vmul.f32 %v340_v30, %v215_v38 }
 0x246   :  { %v284_v43 = vmul.f32 %v618_v52, %v279_v35  ;;  %v322_v46 = vsub.f32 1.0, %v317_v40 }
 0x247   :  { %v346_v53 = vmul.f32 %v341_v41, %v216_v32  ;;  %v318_v24 = vmul.f32 %v626_v45, %v293_v42 }
 0x248   :  { %v289_v54 = vadd.f32 0.2548296, %v284_v43  ;;  %v332_v50 = vsub.f32 0.0, %v322_v46 }
 0x249   :  { %v350_v57 = vpack.c.bf16 %v346_v53, %v345_v47  ;;  %v323_v37 = vsub.f32 1.0, %v318_v24 }
 0x24a   :  { %v294_v58 = vmul.f32 %v618_v52, %v289_v54  ;;  %v337_v59 = vsel %vm327_vm5, %v322_v46, %v332_v50 }
 0x24b   :  { %v333_v60 = vsub.f32 0.0, %v323_v37  ;;  %560 = vmatmul.mubr.bf16.vlgmr.msra.gmra.mrb[12].mxu0 %v350_v57  ;;  %v342_v62 = vadd.f32 1.0, %v337_v59 }
 0x24c   :  { %v319_v33 = vmul.f32 %v628_v29, %v294_v58 }
 0x24d   :  { %v338_v31 = vsel %vm328_vm6, %v323_v37, %v333_v60  ;;  %v347_v10 = vmul.f32 %v342_v62, %v217_v55 }
 0x24e   :  { %v324_v63 = vsub.f32 1.0, %v319_v33  ;;  %v343_v6 = vadd.f32 1.0, %v338_v31 }
 0x250   :  { %v334_v9 = vsub.f32 0.0, %v324_v63  ;;  %v348_v48 = vmul.f32 %v343_v6, %v218_v4 }
 0x252   :  { %v339_v52 = vsel %vm329_vm7, %v324_v63, %v334_v9  ;;  %v351_v12 = vpack.c.bf16 %v348_v48, %v347_v10 }
 0x253   :  { %v344_v13 = vadd.f32 1.0, %v339_v52 }
 0x254   :  { %564 = vmatmul.mubr.bf16.vlgmr.msra.gmra.mrb[0].mxu1 %v351_v12 }
 0x255   :  { %567 = vmatprep.mubr.msk.bf16.mxu1 %vm630_vm2, %v629_v36  ;;  %v349_v51 = vmul.f32 %v344_v13, %v219_v14 }
 0x257   :  { %v352_v16 = vpack.c.bf16 %v349_v51, %v349_v51 }
 0x25c   :  { %568 = vmatmul.mubr.bf16.gmra.mrb[4].mxu1 %v352_v16 }
 0x31e   :  { %v458_v49 = vpop.f32.mrb[12].mxu0 }
 0x31f   :  { %v459_v17 = vadd.f32 %v502_v44, %v458_v49  ;;  %v561_v15 = vpop.f32.mrb[13].mxu0 }
 0x320   :  { %v461_v61 = vpop.f32.mrb[14].mxu0 }
 0x321   :  { %v480_v18 = vadd.f32 %v459_v17, %v674_v0  ;;  %v462_v7 = vadd.f32 %v502_v44, %v461_v61  ;;  %v562_v3 = vpop.f32.mrb[15].mxu0 }
 0x323   :  { %485 = vst.msk [vmem:[%s878_s7] sm:$0xff] %vm34_vm0, %v480_v18  ;;  %v481_v36 = vadd.f32 %v462_v7, %v684_v2 }
 0x325   :  { %486 = vst.msk [vmem:[%s878_s7 + $0x8] sm:$0xff] %vm34_vm0, %v481_v36 }
 0x327   :  { %v466_v56 = vpop.f32.mrb[0].mxu1 }
 0x328   :  { %v467_v19 = vadd.f32 %v502_v44, %v466_v56  ;;  %v565_v20 = vpop.f32.mrb[1].mxu1 }
 0x329   :  { %v469_v21 = vpop.f32.mrb[2].mxu1 }
 0x32a   :  { %v482_v0 = vadd.f32 %v467_v19, %v679_v1  ;;  %v470_v22 = vadd.f32 %v502_v44, %v469_v21  ;;  %v566_v23 = vpop.f32.mrb[3].mxu1 }
 0x32c   :  { %487 = vst.msk [vmem:[%s878_s7 + $0x10] sm:$0xff] %vm34_vm0, %v482_v0  ;;  %v483_v2 = vadd.f32 %v470_v22, %v693_v5 }
 0x32e   :  { %488 = vst.msk [vmem:[%s878_s7 + $0x18] sm:$0xff] %vm34_vm0, %v483_v2 }
 0x32f   :  { %v474_v25 = vpop.f32.mrb[4].mxu1 }
 0x330   :  { %v475_v11 = vadd.f32 %v502_v44, %v474_v25  ;;  %v569_v26 = vpop.f32.mrb[5].mxu1 }
 0x331   :  { %v477_v27 = vpop.f32.mrb[6].mxu1 }
 0x332   :  { %v484_v1 = vadd.f32 %v475_v11, %v702_v8  ;;  %v570_v28 = vpop.f32.mrb[7].mxu1 }
 0x334   :  { %489 = vst.msk [vmem:[%s878_s7 + $0x20] sm:$0x3] %vm47_vm1, %v484_v1 }

</bundles_post_ra>
